<compile_context>
chip_gen: v7x
topology: tpu7x:2x2x1
jax: 0.10.0
libtpu: 0.0.40
codegen_flags: <defaults>
</compile_context>

<pallas_src>
import jax
import jax.numpy as jnp
from jax import lax
from jax.experimental import pallas as pl
from jax.experimental.pallas import tpu as pltpu

K = 7      # conv kernel size
PAD = 3    # padding (same-size output)


def _pick_block_n(n):
    # Batch several images per grid step while keeping the (block_n, HW)
    # output block legal (block_n a multiple of 8, or the full batch).
    for bn in (64, 32, 16, 8):
        if n % bn == 0:
            return bn
    return n


def spatial_attention(x, conv_w, conv_b):
    """x: (N, C, H, W); conv_w: (1, 2, 7, 7); conv_b: (1,). Returns (N, 1, H, W)."""
    N, C, H, W = x.shape
    HW = H * W
    # Zero margin on both sides of the packed [avg | max] planes so every
    # tap's shifted window is an in-bounds static lane slice; rounded to a
    # multiple of 128 so the concat below is pure vreg placement.
    OFF = ((PAD * W + PAD + 127) // 128) * 128
    TN = _pick_block_n(N)

    # Per-tap lane vector folding the conv weight and the zero-padding border
    # validity mask, laid out for the packed [avg | max] planes: (K*K, 2*HW).
    hh = jnp.arange(HW) // W
    ww = jnp.arange(HW) % W
    taps = jnp.arange(K * K)
    dy = (taps // K)[:, None]
    dx = (taps % K)[:, None]
    rr = hh[None, :] + dy - PAD
    cc = ww[None, :] + dx - PAD
    valid = ((rr >= 0) & (rr < H) & (cc >= 0) & (cc < W)).astype(jnp.float32)
    w_avg = conv_w[0, 0].astype(jnp.float32).reshape(K * K, 1)
    w_max = conv_w[0, 1].astype(jnp.float32).reshape(K * K, 1)
    wm = jnp.concatenate([w_avg * valid, w_max * valid], axis=-1)   # (49, 2*HW)
    b = conv_b.astype(jnp.float32).reshape(1)

    x_flat = x.reshape(N, C, HW)

    def kernel(wm_ref, b_ref, x_ref, o_ref):
        # wm_ref: VMEM (K*K, 2*HW) per-tap weight * border-mask lane vectors
        # b_ref : SMEM (1,) conv bias
        # x_ref : VMEM (TN, C, HW) input block (NCHW with spatial flattened)
        # o_ref : VMEM (TN, HW) output block
        xb = x_ref[...].astype(jnp.float32)           # (TN, C, HW)
        avg = jnp.mean(xb, axis=1)                    # (TN, HW) channel mean
        mx = jnp.max(xb, axis=1)                      # (TN, HW) channel max
        tn = avg.shape[0]

        margin = jnp.zeros((tn, OFF), jnp.float32)
        # [zeros | avg | max | zeros]; out-of-image taps read the margins or
        # the neighbouring half, both zeroed by the mask folded into wm.
        g = jnp.concatenate([margin, avg, mx, margin], axis=-1)   # (TN, 2*OFF+2*HW)

        acc = jnp.zeros((tn, 2 * HW), jnp.float32)
        for dyi in range(K):
            for dxi in range(K):
                t = dyi * K + dxi
                s = (dyi - PAD) * W + (dxi - PAD)
                win = g[:, OFF + s: OFF + s + 2 * HW]             # shared shifted window
                acc = acc + wm_ref[t:t + 1, :] * win              # 1 mul + 1 add per tap

        att = acc[:, :HW] + acc[:, HW:] + b_ref[0]                # avg + max contributions
        o_ref[...] = jax.nn.sigmoid(att).astype(o_ref.dtype)

    # NOTE: for very large C*H*W, add a channel-tile ("arbitrary") grid axis
    # with running sum/max accumulators to stay inside VMEM (64 MiB on v7x).
    out_flat = pl.pallas_call(
        kernel,
        out_shape=jax.ShapeDtypeStruct((N, HW), x.dtype),
        grid=(N // TN,),
        in_specs=[
            pl.BlockSpec((K * K, 2 * HW), lambda n: (0, 0)),       # folded weights+mask
            pl.BlockSpec(memory_space=pltpu.MemorySpace.SMEM),     # bias
            pl.BlockSpec((TN, C, HW), lambda n: (n, 0, 0)),        # input block
        ],
        out_specs=pl.BlockSpec((TN, HW), lambda n: (n, 0)),        # lane-dense store
        compiler_params=pltpu.CompilerParams(
            dimension_semantics=("parallel",)),
    )(wm, b, x_flat)
    return out_flat.reshape(N, 1, H, W)


def _reference(x, conv_w, conv_b):
    # pure-JAX reference matching the PyTorch forward
    avg = jnp.mean(x, axis=1, keepdims=True)
    mx = jnp.max(x, axis=1, keepdims=True)
    out = jnp.concatenate([avg, mx], axis=1)                # (N, 2, H, W)
    out = lax.conv_general_dilated(
        out, conv_w, window_strides=(1, 1), padding=((PAD, PAD), (PAD, PAD)),
        dimension_numbers=("NCHW", "OIHW", "NCHW"))
    out = out + conv_b.reshape(1, 1, 1, 1)
    return jax.nn.sigmoid(out)


if __name__ == "__main__":
    key = jax.random.PRNGKey(0)
    kx, kw, kb = jax.random.split(key, 3)

    N, C, H, W = 2, 4, 16, 16
    x = jax.random.normal(kx, (N, C, H, W), dtype=jnp.float32)

    # deterministic parameter init (Conv2d(2 -> 1, kernel_size=7) shapes)
    fan_in = 2 * K * K
    bound = 1.0 / jnp.sqrt(fan_in)
    conv_w = jax.random.uniform(kw, (1, 2, K, K), jnp.float32, -bound, bound)
    conv_b = jax.random.uniform(kb, (1,), jnp.float32, -bound, bound)

    out = spatial_attention(x, conv_w, conv_b)
    out = jax.block_until_ready(out)

    ref = _reference(x, conv_w, conv_b)
    assert out.shape == (N, 1, H, W)
    assert jnp.allclose(out, ref, atol=1e-5, rtol=1e-5)

    print("KERNEL_OK")
</pallas_src>

<mosaic_0001>
module attributes {stable_mosaic.version = 11 : i64} {
  func.func @kernel(%arg0: i32, %arg1: memref<49x512xf32, #tpu.memory_space<vmem>>, %arg2: memref<1xf32, #tpu.memory_space<smem>>, %arg3: memref<2x4x256xf32, #tpu.memory_space<vmem>>, %arg4: memref<2x256xf32, #tpu.memory_space<vmem>>) attributes {dimension_semantics = [#tpu.dimension_semantics<parallel>], iteration_bounds = array<i64: 1>, scalar_prefetch = 0 : i64, scratch_operands = 0 : i64, tpu.core_type = #tpu.core_type<tc>, window_params = [{pipeline_mode = #tpu.pipeline_mode<synchronous>, transform_indices = @transform_0, window_bounds = array<i64: 49, 512>}, {transform_indices = @transform_1, window_bounds = array<i64: 1>}, {transform_indices = @transform_2, window_bounds = array<i64: 2, 4, 256>}, {transform_indices = @transform_3, window_bounds = array<i64: 2, 256>}]} {
    %c0 = arith.constant 0 : index
    %c0_0 = arith.constant 0 : index
    %c0_1 = arith.constant 0 : index
    %0 = vector.load %arg3[%c0, %c0_0, %c0_1] : memref<2x4x256xf32, #tpu.memory_space<vmem>>, vector<2x4x256xf32>
    %cst = arith.constant dense<0.000000e+00> : vector<2x256xf32>
    %1 = vector.multi_reduction <add>, %0, %cst [1] : vector<2x4x256xf32> to vector<2x256xf32>
    %cst_2 = arith.constant 4.000000e+00 : f32
    %2 = vector.broadcast %cst_2 : f32 to vector<2x256xf32>
    %3 = arith.divf %1, %2 : vector<2x256xf32>
    %cst_3 = arith.constant dense<0xFF800000> : vector<2x256xf32>
    %4 = vector.multi_reduction <maximumf>, %0, %cst_3 [1] : vector<2x4x256xf32> to vector<2x256xf32>
    %cst_4 = arith.constant 0.000000e+00 : f32
    %5 = vector.broadcast %cst_4 : f32 to vector<2x128xf32>
    %6 = tpu.concatenate %5, %3, %4, %5 in 1 : vector<2x128xf32>, vector<2x256xf32>, vector<2x256xf32>, vector<2x128xf32> -> vector<2x768xf32>
    %cst_5 = arith.constant 0.000000e+00 : f32
    %7 = vector.broadcast %cst_5 : f32 to vector<2x512xf32>
    %8 = vector.extract_strided_slice %6 {offsets = [0, 77], sizes = [2, 512], strides = [1, 1]} : vector<2x768xf32> to vector<2x512xf32>
    %c0_6 = arith.constant 0 : index
    %c0_7 = arith.constant 0 : index
    %9 = vector.load %arg1[%c0_6, %c0_7] : memref<49x512xf32, #tpu.memory_space<vmem>>, vector<1x512xf32>
    %10 = vector.broadcast %9 : vector<1x512xf32> to vector<2x512xf32>
    %11 = arith.mulf %10, %8 : vector<2x512xf32>
    %12 = arith.addf %7, %11 : vector<2x512xf32>
    %13 = vector.extract_strided_slice %6 {offsets = [0, 78], sizes = [2, 512], strides = [1, 1]} : vector<2x768xf32> to vector<2x512xf32>
    %c1 = arith.constant 1 : index
    %c0_8 = arith.constant 0 : index
    %14 = vector.load %arg1[%c1, %c0_8] : memref<49x512xf32, #tpu.memory_space<vmem>>, vector<1x512xf32>
    %15 = vector.broadcast %14 : vector<1x512xf32> to vector<2x512xf32>
    %16 = arith.mulf %15, %13 : vector<2x512xf32>
    %17 = arith.addf %12, %16 : vector<2x512xf32>
    %18 = vector.extract_strided_slice %6 {offsets = [0, 79], sizes = [2, 512], strides = [1, 1]} : vector<2x768xf32> to vector<2x512xf32>
    %c2 = arith.constant 2 : index
    %c0_9 = arith.constant 0 : index
    %19 = vector.load %arg1[%c2, %c0_9] : memref<49x512xf32, #tpu.memory_space<vmem>>, vector<1x512xf32>
    %20 = vector.broadcast %19 : vector<1x512xf32> to vector<2x512xf32>
    %21 = arith.mulf %20, %18 : vector<2x512xf32>
    %22 = arith.addf %17, %21 : vector<2x512xf32>
    %23 = vector.extract_strided_slice %6 {offsets = [0, 80], sizes = [2, 512], strides = [1, 1]} : vector<2x768xf32> to vector<2x512xf32>
    %c3 = arith.constant 3 : index
    %c0_10 = arith.constant 0 : index
    %24 = vector.load %arg1[%c3, %c0_10] : memref<49x512xf32, #tpu.memory_space<vmem>>, vector<1x512xf32>
    %25 = vector.broadcast %24 : vector<1x512xf32> to vector<2x512xf32>
    %26 = arith.mulf %25, %23 : vector<2x512xf32>
    %27 = arith.addf %22, %26 : vector<2x512xf32>
    %28 = vector.extract_strided_slice %6 {offsets = [0, 81], sizes = [2, 512], strides = [1, 1]} : vector<2x768xf32> to vector<2x512xf32>
    %c4 = arith.constant 4 : index
    %c0_11 = arith.constant 0 : index
    %29 = vector.load %arg1[%c4, %c0_11] : memref<49x512xf32, #tpu.memory_space<vmem>>, vector<1x512xf32>
    %30 = vector.broadcast %29 : vector<1x512xf32> to vector<2x512xf32>
    %31 = arith.mulf %30, %28 : vector<2x512xf32>
    %32 = arith.addf %27, %31 : vector<2x512xf32>
    %33 = vector.extract_strided_slice %6 {offsets = [0, 82], sizes = [2, 512], strides = [1, 1]} : vector<2x768xf32> to vector<2x512xf32>
    %c5 = arith.constant 5 : index
    %c0_12 = arith.constant 0 : index
    %34 = vector.load %arg1[%c5, %c0_12] : memref<49x512xf32, #tpu.memory_space<vmem>>, vector<1x512xf32>
    %35 = vector.broadcast %34 : vector<1x512xf32> to vector<2x512xf32>
    %36 = arith.mulf %35, %33 : vector<2x512xf32>
    %37 = arith.addf %32, %36 : vector<2x512xf32>
    %38 = vector.extract_strided_slice %6 {offsets = [0, 83], sizes = [2, 512], strides = [1, 1]} : vector<2x768xf32> to vector<2x512xf32>
    %c6 = arith.constant 6 : index
    %c0_13 = arith.constant 0 : index
    %39 = vector.load %arg1[%c6, %c0_13] : memref<49x512xf32, #tpu.memory_space<vmem>>, vector<1x512xf32>
    %40 = vector.broadcast %39 : vector<1x512xf32> to vector<2x512xf32>
    %41 = arith.mulf %40, %38 : vector<2x512xf32>
    %42 = arith.addf %37, %41 : vector<2x512xf32>
    %43 = vector.extract_strided_slice %6 {offsets = [0, 93], sizes = [2, 512], strides = [1, 1]} : vector<2x768xf32> to vector<2x512xf32>
    %c7 = arith.constant 7 : index
    %c0_14 = arith.constant 0 : index
    %44 = vector.load %arg1[%c7, %c0_14] : memref<49x512xf32, #tpu.memory_space<vmem>>, vector<1x512xf32>
    %45 = vector.broadcast %44 : vector<1x512xf32> to vector<2x512xf32>
    %46 = arith.mulf %45, %43 : vector<2x512xf32>
    %47 = arith.addf %42, %46 : vector<2x512xf32>
    %48 = vector.extract_strided_slice %6 {offsets = [0, 94], sizes = [2, 512], strides = [1, 1]} : vector<2x768xf32> to vector<2x512xf32>
    %c8 = arith.constant 8 : index
    %c0_15 = arith.constant 0 : index
    %49 = vector.load %arg1[%c8, %c0_15] : memref<49x512xf32, #tpu.memory_space<vmem>>, vector<1x512xf32>
    %50 = vector.broadcast %49 : vector<1x512xf32> to vector<2x512xf32>
    %51 = arith.mulf %50, %48 : vector<2x512xf32>
    %52 = arith.addf %47, %51 : vector<2x512xf32>
    %53 = vector.extract_strided_slice %6 {offsets = [0, 95], sizes = [2, 512], strides = [1, 1]} : vector<2x768xf32> to vector<2x512xf32>
    %c9 = arith.constant 9 : index
    %c0_16 = arith.constant 0 : index
    %54 = vector.load %arg1[%c9, %c0_16] : memref<49x512xf32, #tpu.memory_space<vmem>>, vector<1x512xf32>
    %55 = vector.broadcast %54 : vector<1x512xf32> to vector<2x512xf32>
    %56 = arith.mulf %55, %53 : vector<2x512xf32>
    %57 = arith.addf %52, %56 : vector<2x512xf32>
    %58 = vector.extract_strided_slice %6 {offsets = [0, 96], sizes = [2, 512], strides = [1, 1]} : vector<2x768xf32> to vector<2x512xf32>
    %c10 = arith.constant 10 : index
    %c0_17 = arith.constant 0 : index
    %59 = vector.load %arg1[%c10, %c0_17] : memref<49x512xf32, #tpu.memory_space<vmem>>, vector<1x512xf32>
    %60 = vector.broadcast %59 : vector<1x512xf32> to vector<2x512xf32>
    %61 = arith.mulf %60, %58 : vector<2x512xf32>
    %62 = arith.addf %57, %61 : vector<2x512xf32>
    %63 = vector.extract_strided_slice %6 {offsets = [0, 97], sizes = [2, 512], strides = [1, 1]} : vector<2x768xf32> to vector<2x512xf32>
    %c11 = arith.constant 11 : index
    %c0_18 = arith.constant 0 : index
    %64 = vector.load %arg1[%c11, %c0_18] : memref<49x512xf32, #tpu.memory_space<vmem>>, vector<1x512xf32>
    %65 = vector.broadcast %64 : vector<1x512xf32> to vector<2x512xf32>
    %66 = arith.mulf %65, %63 : vector<2x512xf32>
    %67 = arith.addf %62, %66 : vector<2x512xf32>
    %68 = vector.extract_strided_slice %6 {offsets = [0, 98], sizes = [2, 512], strides = [1, 1]} : vector<2x768xf32> to vector<2x512xf32>
    %c12 = arith.constant 12 : index
    %c0_19 = arith.constant 0 : index
    %69 = vector.load %arg1[%c12, %c0_19] : memref<49x512xf32, #tpu.memory_space<vmem>>, vector<1x512xf32>
    %70 = vector.broadcast %69 : vector<1x512xf32> to vector<2x512xf32>
    %71 = arith.mulf %70, %68 : vector<2x512xf32>
    %72 = arith.addf %67, %71 : vector<2x512xf32>
    %73 = vector.extract_strided_slice %6 {offsets = [0, 99], sizes = [2, 512], strides = [1, 1]} : vector<2x768xf32> to vector<2x512xf32>
    %c13 = arith.constant 13 : index
    %c0_20 = arith.constant 0 : index
    %74 = vector.load %arg1[%c13, %c0_20] : memref<49x512xf32, #tpu.memory_space<vmem>>, vector<1x512xf32>
    %75 = vector.broadcast %74 : vector<1x512xf32> to vector<2x512xf32>
    %76 = arith.mulf %75, %73 : vector<2x512xf32>
    %77 = arith.addf %72, %76 : vector<2x512xf32>
    %78 = vector.extract_strided_slice %6 {offsets = [0, 109], sizes = [2, 512], strides = [1, 1]} : vector<2x768xf32> to vector<2x512xf32>
    %c14 = arith.constant 14 : index
    %c0_21 = arith.constant 0 : index
    %79 = vector.load %arg1[%c14, %c0_21] : memref<49x512xf32, #tpu.memory_space<vmem>>, vector<1x512xf32>
    %80 = vector.broadcast %79 : vector<1x512xf32> to vector<2x512xf32>
    %81 = arith.mulf %80, %78 : vector<2x512xf32>
    %82 = arith.addf %77, %81 : vector<2x512xf32>
    %83 = vector.extract_strided_slice %6 {offsets = [0, 110], sizes = [2, 512], strides = [1, 1]} : vector<2x768xf32> to vector<2x512xf32>
    %c15 = arith.constant 15 : index
    %c0_22 = arith.constant 0 : index
    %84 = vector.load %arg1[%c15, %c0_22] : memref<49x512xf32, #tpu.memory_space<vmem>>, vector<1x512xf32>
    %85 = vector.broadcast %84 : vector<1x512xf32> to vector<2x512xf32>
    %86 = arith.mulf %85, %83 : vector<2x512xf32>
    %87 = arith.addf %82, %86 : vector<2x512xf32>
    %88 = vector.extract_strided_slice %6 {offsets = [0, 111], sizes = [2, 512], strides = [1, 1]} : vector<2x768xf32> to vector<2x512xf32>
    %c16 = arith.constant 16 : index
    %c0_23 = arith.constant 0 : index
    %89 = vector.load %arg1[%c16, %c0_23] : memref<49x512xf32, #tpu.memory_space<vmem>>, vector<1x512xf32>
    %90 = vector.broadcast %89 : vector<1x512xf32> to vector<2x512xf32>
    %91 = arith.mulf %90, %88 : vector<2x512xf32>
    %92 = arith.addf %87, %91 : vector<2x512xf32>
    %93 = vector.extract_strided_slice %6 {offsets = [0, 112], sizes = [2, 512], strides = [1, 1]} : vector<2x768xf32> to vector<2x512xf32>
    %c17 = arith.constant 17 : index
    %c0_24 = arith.constant 0 : index
    %94 = vector.load %arg1[%c17, %c0_24] : memref<49x512xf32, #tpu.memory_space<vmem>>, vector<1x512xf32>
    %95 = vector.broadcast %94 : vector<1x512xf32> to vector<2x512xf32>
    %96 = arith.mulf %95, %93 : vector<2x512xf32>
    %97 = arith.addf %92, %96 : vector<2x512xf32>
    %98 = vector.extract_strided_slice %6 {offsets = [0, 113], sizes = [2, 512], strides = [1, 1]} : vector<2x768xf32> to vector<2x512xf32>
    %c18 = arith.constant 18 : index
    %c0_25 = arith.constant 0 : index
    %99 = vector.load %arg1[%c18, %c0_25] : memref<49x512xf32, #tpu.memory_space<vmem>>, vector<1x512xf32>
    %100 = vector.broadcast %99 : vector<1x512xf32> to vector<2x512xf32>
    %101 = arith.mulf %100, %98 : vector<2x512xf32>
    %102 = arith.addf %97, %101 : vector<2x512xf32>
    %103 = vector.extract_strided_slice %6 {offsets = [0, 114], sizes = [2, 512], strides = [1, 1]} : vector<2x768xf32> to vector<2x512xf32>
    %c19 = arith.constant 19 : index
    %c0_26 = arith.constant 0 : index
    %104 = vector.load %arg1[%c19, %c0_26] : memref<49x512xf32, #tpu.memory_space<vmem>>, vector<1x512xf32>
    %105 = vector.broadcast %104 : vector<1x512xf32> to vector<2x512xf32>
    %106 = arith.mulf %105, %103 : vector<2x512xf32>
    %107 = arith.addf %102, %106 : vector<2x512xf32>
    %108 = vector.extract_strided_slice %6 {offsets = [0, 115], sizes = [2, 512], strides = [1, 1]} : vector<2x768xf32> to vector<2x512xf32>
    %c20 = arith.constant 20 : index
    %c0_27 = arith.constant 0 : index
    %109 = vector.load %arg1[%c20, %c0_27] : memref<49x512xf32, #tpu.memory_space<vmem>>, vector<1x512xf32>
    %110 = vector.broadcast %109 : vector<1x512xf32> to vector<2x512xf32>
    %111 = arith.mulf %110, %108 : vector<2x512xf32>
    %112 = arith.addf %107, %111 : vector<2x512xf32>
    %113 = vector.extract_strided_slice %6 {offsets = [0, 125], sizes = [2, 512], strides = [1, 1]} : vector<2x768xf32> to vector<2x512xf32>
    %c21 = arith.constant 21 : index
    %c0_28 = arith.constant 0 : index
    %114 = vector.load %arg1[%c21, %c0_28] : memref<49x512xf32, #tpu.memory_space<vmem>>, vector<1x512xf32>
    %115 = vector.broadcast %114 : vector<1x512xf32> to vector<2x512xf32>
    %116 = arith.mulf %115, %113 : vector<2x512xf32>
    %117 = arith.addf %112, %116 : vector<2x512xf32>
    %118 = vector.extract_strided_slice %6 {offsets = [0, 126], sizes = [2, 512], strides = [1, 1]} : vector<2x768xf32> to vector<2x512xf32>
    %c22 = arith.constant 22 : index
    %c0_29 = arith.constant 0 : index
    %119 = vector.load %arg1[%c22, %c0_29] : memref<49x512xf32, #tpu.memory_space<vmem>>, vector<1x512xf32>
    %120 = vector.broadcast %119 : vector<1x512xf32> to vector<2x512xf32>
    %121 = arith.mulf %120, %118 : vector<2x512xf32>
    %122 = arith.addf %117, %121 : vector<2x512xf32>
    %123 = vector.extract_strided_slice %6 {offsets = [0, 127], sizes = [2, 512], strides = [1, 1]} : vector<2x768xf32> to vector<2x512xf32>
    %c23 = arith.constant 23 : index
    %c0_30 = arith.constant 0 : index
    %124 = vector.load %arg1[%c23, %c0_30] : memref<49x512xf32, #tpu.memory_space<vmem>>, vector<1x512xf32>
    %125 = vector.broadcast %124 : vector<1x512xf32> to vector<2x512xf32>
    %126 = arith.mulf %125, %123 : vector<2x512xf32>
    %127 = arith.addf %122, %126 : vector<2x512xf32>
    %128 = vector.extract_strided_slice %6 {offsets = [0, 128], sizes = [2, 512], strides = [1, 1]} : vector<2x768xf32> to vector<2x512xf32>
    %c24 = arith.constant 24 : index
    %c0_31 = arith.constant 0 : index
    %129 = vector.load %arg1[%c24, %c0_31] : memref<49x512xf32, #tpu.memory_space<vmem>>, vector<1x512xf32>
    %130 = vector.broadcast %129 : vector<1x512xf32> to vector<2x512xf32>
    %131 = arith.mulf %130, %128 : vector<2x512xf32>
    %132 = arith.addf %127, %131 : vector<2x512xf32>
    %133 = vector.extract_strided_slice %6 {offsets = [0, 129], sizes = [2, 512], strides = [1, 1]} : vector<2x768xf32> to vector<2x512xf32>
    %c25 = arith.constant 25 : index
    %c0_32 = arith.constant 0 : index
    %134 = vector.load %arg1[%c25, %c0_32] : memref<49x512xf32, #tpu.memory_space<vmem>>, vector<1x512xf32>
    %135 = vector.broadcast %134 : vector<1x512xf32> to vector<2x512xf32>
    %136 = arith.mulf %135, %133 : vector<2x512xf32>
    %137 = arith.addf %132, %136 : vector<2x512xf32>
    %138 = vector.extract_strided_slice %6 {offsets = [0, 130], sizes = [2, 512], strides = [1, 1]} : vector<2x768xf32> to vector<2x512xf32>
    %c26 = arith.constant 26 : index
    %c0_33 = arith.constant 0 : index
    %139 = vector.load %arg1[%c26, %c0_33] : memref<49x512xf32, #tpu.memory_space<vmem>>, vector<1x512xf32>
    %140 = vector.broadcast %139 : vector<1x512xf32> to vector<2x512xf32>
    %141 = arith.mulf %140, %138 : vector<2x512xf32>
    %142 = arith.addf %137, %141 : vector<2x512xf32>
    %143 = vector.extract_strided_slice %6 {offsets = [0, 131], sizes = [2, 512], strides = [1, 1]} : vector<2x768xf32> to vector<2x512xf32>
    %c27 = arith.constant 27 : index
    %c0_34 = arith.constant 0 : index
    %144 = vector.load %arg1[%c27, %c0_34] : memref<49x512xf32, #tpu.memory_space<vmem>>, vector<1x512xf32>
    %145 = vector.broadcast %144 : vector<1x512xf32> to vector<2x512xf32>
    %146 = arith.mulf %145, %143 : vector<2x512xf32>
    %147 = arith.addf %142, %146 : vector<2x512xf32>
    %148 = vector.extract_strided_slice %6 {offsets = [0, 141], sizes = [2, 512], strides = [1, 1]} : vector<2x768xf32> to vector<2x512xf32>
    %c28 = arith.constant 28 : index
    %c0_35 = arith.constant 0 : index
    %149 = vector.load %arg1[%c28, %c0_35] : memref<49x512xf32, #tpu.memory_space<vmem>>, vector<1x512xf32>
    %150 = vector.broadcast %149 : vector<1x512xf32> to vector<2x512xf32>
    %151 = arith.mulf %150, %148 : vector<2x512xf32>
    %152 = arith.addf %147, %151 : vector<2x512xf32>
    %153 = vector.extract_strided_slice %6 {offsets = [0, 142], sizes = [2, 512], strides = [1, 1]} : vector<2x768xf32> to vector<2x512xf32>
    %c29 = arith.constant 29 : index
    %c0_36 = arith.constant 0 : index
    %154 = vector.load %arg1[%c29, %c0_36] : memref<49x512xf32, #tpu.memory_space<vmem>>, vector<1x512xf32>
    %155 = vector.broadcast %154 : vector<1x512xf32> to vector<2x512xf32>
    %156 = arith.mulf %155, %153 : vector<2x512xf32>
    %157 = arith.addf %152, %156 : vector<2x512xf32>
    %158 = vector.extract_strided_slice %6 {offsets = [0, 143], sizes = [2, 512], strides = [1, 1]} : vector<2x768xf32> to vector<2x512xf32>
    %c30 = arith.constant 30 : index
    %c0_37 = arith.constant 0 : index
    %159 = vector.load %arg1[%c30, %c0_37] : memref<49x512xf32, #tpu.memory_space<vmem>>, vector<1x512xf32>
    %160 = vector.broadcast %159 : vector<1x512xf32> to vector<2x512xf32>
    %161 = arith.mulf %160, %158 : vector<2x512xf32>
    %162 = arith.addf %157, %161 : vector<2x512xf32>
    %163 = vector.extract_strided_slice %6 {offsets = [0, 144], sizes = [2, 512], strides = [1, 1]} : vector<2x768xf32> to vector<2x512xf32>
    %c31 = arith.constant 31 : index
    %c0_38 = arith.constant 0 : index
    %164 = vector.load %arg1[%c31, %c0_38] : memref<49x512xf32, #tpu.memory_space<vmem>>, vector<1x512xf32>
    %165 = vector.broadcast %164 : vector<1x512xf32> to vector<2x512xf32>
    %166 = arith.mulf %165, %163 : vector<2x512xf32>
    %167 = arith.addf %162, %166 : vector<2x512xf32>
    %168 = vector.extract_strided_slice %6 {offsets = [0, 145], sizes = [2, 512], strides = [1, 1]} : vector<2x768xf32> to vector<2x512xf32>
    %c32 = arith.constant 32 : index
    %c0_39 = arith.constant 0 : index
    %169 = vector.load %arg1[%c32, %c0_39] : memref<49x512xf32, #tpu.memory_space<vmem>>, vector<1x512xf32>
    %170 = vector.broadcast %169 : vector<1x512xf32> to vector<2x512xf32>
    %171 = arith.mulf %170, %168 : vector<2x512xf32>
    %172 = arith.addf %167, %171 : vector<2x512xf32>
    %173 = vector.extract_strided_slice %6 {offsets = [0, 146], sizes = [2, 512], strides = [1, 1]} : vector<2x768xf32> to vector<2x512xf32>
    %c33 = arith.constant 33 : index
    %c0_40 = arith.constant 0 : index
    %174 = vector.load %arg1[%c33, %c0_40] : memref<49x512xf32, #tpu.memory_space<vmem>>, vector<1x512xf32>
    %175 = vector.broadcast %174 : vector<1x512xf32> to vector<2x512xf32>
    %176 = arith.mulf %175, %173 : vector<2x512xf32>
    %177 = arith.addf %172, %176 : vector<2x512xf32>
    %178 = vector.extract_strided_slice %6 {offsets = [0, 147], sizes = [2, 512], strides = [1, 1]} : vector<2x768xf32> to vector<2x512xf32>
    %c34 = arith.constant 34 : index
    %c0_41 = arith.constant 0 : index
    %179 = vector.load %arg1[%c34, %c0_41] : memref<49x512xf32, #tpu.memory_space<vmem>>, vector<1x512xf32>
    %180 = vector.broadcast %179 : vector<1x512xf32> to vector<2x512xf32>
    %181 = arith.mulf %180, %178 : vector<2x512xf32>
    %182 = arith.addf %177, %181 : vector<2x512xf32>
    %183 = vector.extract_strided_slice %6 {offsets = [0, 157], sizes = [2, 512], strides = [1, 1]} : vector<2x768xf32> to vector<2x512xf32>
    %c35 = arith.constant 35 : index
    %c0_42 = arith.constant 0 : index
    %184 = vector.load %arg1[%c35, %c0_42] : memref<49x512xf32, #tpu.memory_space<vmem>>, vector<1x512xf32>
    %185 = vector.broadcast %184 : vector<1x512xf32> to vector<2x512xf32>
    %186 = arith.mulf %185, %183 : vector<2x512xf32>
    %187 = arith.addf %182, %186 : vector<2x512xf32>
    %188 = vector.extract_strided_slice %6 {offsets = [0, 158], sizes = [2, 512], strides = [1, 1]} : vector<2x768xf32> to vector<2x512xf32>
    %c36 = arith.constant 36 : index
    %c0_43 = arith.constant 0 : index
    %189 = vector.load %arg1[%c36, %c0_43] : memref<49x512xf32, #tpu.memory_space<vmem>>, vector<1x512xf32>
    %190 = vector.broadcast %189 : vector<1x512xf32> to vector<2x512xf32>
    %191 = arith.mulf %190, %188 : vector<2x512xf32>
    %192 = arith.addf %187, %191 : vector<2x512xf32>
    %193 = vector.extract_strided_slice %6 {offsets = [0, 159], sizes = [2, 512], strides = [1, 1]} : vector<2x768xf32> to vector<2x512xf32>
    %c37 = arith.constant 37 : index
    %c0_44 = arith.constant 0 : index
    %194 = vector.load %arg1[%c37, %c0_44] : memref<49x512xf32, #tpu.memory_space<vmem>>, vector<1x512xf32>
    %195 = vector.broadcast %194 : vector<1x512xf32> to vector<2x512xf32>
    %196 = arith.mulf %195, %193 : vector<2x512xf32>
    %197 = arith.addf %192, %196 : vector<2x512xf32>
    %198 = vector.extract_strided_slice %6 {offsets = [0, 160], sizes = [2, 512], strides = [1, 1]} : vector<2x768xf32> to vector<2x512xf32>
    %c38 = arith.constant 38 : index
    %c0_45 = arith.constant 0 : index
    %199 = vector.load %arg1[%c38, %c0_45] : memref<49x512xf32, #tpu.memory_space<vmem>>, vector<1x512xf32>
    %200 = vector.broadcast %199 : vector<1x512xf32> to vector<2x512xf32>
    %201 = arith.mulf %200, %198 : vector<2x512xf32>
    %202 = arith.addf %197, %201 : vector<2x512xf32>
    %203 = vector.extract_strided_slice %6 {offsets = [0, 161], sizes = [2, 512], strides = [1, 1]} : vector<2x768xf32> to vector<2x512xf32>
    %c39 = arith.constant 39 : index
    %c0_46 = arith.constant 0 : index
    %204 = vector.load %arg1[%c39, %c0_46] : memref<49x512xf32, #tpu.memory_space<vmem>>, vector<1x512xf32>
    %205 = vector.broadcast %204 : vector<1x512xf32> to vector<2x512xf32>
    %206 = arith.mulf %205, %203 : vector<2x512xf32>
    %207 = arith.addf %202, %206 : vector<2x512xf32>
    %208 = vector.extract_strided_slice %6 {offsets = [0, 162], sizes = [2, 512], strides = [1, 1]} : vector<2x768xf32> to vector<2x512xf32>
    %c40 = arith.constant 40 : index
    %c0_47 = arith.constant 0 : index
    %209 = vector.load %arg1[%c40, %c0_47] : memref<49x512xf32, #tpu.memory_space<vmem>>, vector<1x512xf32>
    %210 = vector.broadcast %209 : vector<1x512xf32> to vector<2x512xf32>
    %211 = arith.mulf %210, %208 : vector<2x512xf32>
    %212 = arith.addf %207, %211 : vector<2x512xf32>
    %213 = vector.extract_strided_slice %6 {offsets = [0, 163], sizes = [2, 512], strides = [1, 1]} : vector<2x768xf32> to vector<2x512xf32>
    %c41 = arith.constant 41 : index
    %c0_48 = arith.constant 0 : index
    %214 = vector.load %arg1[%c41, %c0_48] : memref<49x512xf32, #tpu.memory_space<vmem>>, vector<1x512xf32>
    %215 = vector.broadcast %214 : vector<1x512xf32> to vector<2x512xf32>
    %216 = arith.mulf %215, %213 : vector<2x512xf32>
    %217 = arith.addf %212, %216 : vector<2x512xf32>
    %218 = vector.extract_strided_slice %6 {offsets = [0, 173], sizes = [2, 512], strides = [1, 1]} : vector<2x768xf32> to vector<2x512xf32>
    %c42 = arith.constant 42 : index
    %c0_49 = arith.constant 0 : index
    %219 = vector.load %arg1[%c42, %c0_49] : memref<49x512xf32, #tpu.memory_space<vmem>>, vector<1x512xf32>
    %220 = vector.broadcast %219 : vector<1x512xf32> to vector<2x512xf32>
    %221 = arith.mulf %220, %218 : vector<2x512xf32>
    %222 = arith.addf %217, %221 : vector<2x512xf32>
    %223 = vector.extract_strided_slice %6 {offsets = [0, 174], sizes = [2, 512], strides = [1, 1]} : vector<2x768xf32> to vector<2x512xf32>
    %c43 = arith.constant 43 : index
    %c0_50 = arith.constant 0 : index
    %224 = vector.load %arg1[%c43, %c0_50] : memref<49x512xf32, #tpu.memory_space<vmem>>, vector<1x512xf32>
    %225 = vector.broadcast %224 : vector<1x512xf32> to vector<2x512xf32>
    %226 = arith.mulf %225, %223 : vector<2x512xf32>
    %227 = arith.addf %222, %226 : vector<2x512xf32>
    %228 = vector.extract_strided_slice %6 {offsets = [0, 175], sizes = [2, 512], strides = [1, 1]} : vector<2x768xf32> to vector<2x512xf32>
    %c44 = arith.constant 44 : index
    %c0_51 = arith.constant 0 : index
    %229 = vector.load %arg1[%c44, %c0_51] : memref<49x512xf32, #tpu.memory_space<vmem>>, vector<1x512xf32>
    %230 = vector.broadcast %229 : vector<1x512xf32> to vector<2x512xf32>
    %231 = arith.mulf %230, %228 : vector<2x512xf32>
    %232 = arith.addf %227, %231 : vector<2x512xf32>
    %233 = vector.extract_strided_slice %6 {offsets = [0, 176], sizes = [2, 512], strides = [1, 1]} : vector<2x768xf32> to vector<2x512xf32>
    %c45 = arith.constant 45 : index
    %c0_52 = arith.constant 0 : index
    %234 = vector.load %arg1[%c45, %c0_52] : memref<49x512xf32, #tpu.memory_space<vmem>>, vector<1x512xf32>
    %235 = vector.broadcast %234 : vector<1x512xf32> to vector<2x512xf32>
    %236 = arith.mulf %235, %233 : vector<2x512xf32>
    %237 = arith.addf %232, %236 : vector<2x512xf32>
    %238 = vector.extract_strided_slice %6 {offsets = [0, 177], sizes = [2, 512], strides = [1, 1]} : vector<2x768xf32> to vector<2x512xf32>
    %c46 = arith.constant 46 : index
    %c0_53 = arith.constant 0 : index
    %239 = vector.load %arg1[%c46, %c0_53] : memref<49x512xf32, #tpu.memory_space<vmem>>, vector<1x512xf32>
    %240 = vector.broadcast %239 : vector<1x512xf32> to vector<2x512xf32>
    %241 = arith.mulf %240, %238 : vector<2x512xf32>
    %242 = arith.addf %237, %241 : vector<2x512xf32>
    %243 = vector.extract_strided_slice %6 {offsets = [0, 178], sizes = [2, 512], strides = [1, 1]} : vector<2x768xf32> to vector<2x512xf32>
    %c47 = arith.constant 47 : index
    %c0_54 = arith.constant 0 : index
    %244 = vector.load %arg1[%c47, %c0_54] : memref<49x512xf32, #tpu.memory_space<vmem>>, vector<1x512xf32>
    %245 = vector.broadcast %244 : vector<1x512xf32> to vector<2x512xf32>
    %246 = arith.mulf %245, %243 : vector<2x512xf32>
    %247 = arith.addf %242, %246 : vector<2x512xf32>
    %248 = vector.extract_strided_slice %6 {offsets = [0, 179], sizes = [2, 512], strides = [1, 1]} : vector<2x768xf32> to vector<2x512xf32>
    %c48 = arith.constant 48 : index
    %c0_55 = arith.constant 0 : index
    %249 = vector.load %arg1[%c48, %c0_55] : memref<49x512xf32, #tpu.memory_space<vmem>>, vector<1x512xf32>
    %250 = vector.broadcast %249 : vector<1x512xf32> to vector<2x512xf32>
    %251 = arith.mulf %250, %248 : vector<2x512xf32>
    %252 = arith.addf %247, %251 : vector<2x512xf32>
    %253 = vector.extract_strided_slice %252 {offsets = [0, 0], sizes = [2, 256], strides = [1, 1]} : vector<2x512xf32> to vector<2x256xf32>
    %254 = vector.extract_strided_slice %252 {offsets = [0, 256], sizes = [2, 256], strides = [1, 1]} : vector<2x512xf32> to vector<2x256xf32>
    %255 = arith.addf %253, %254 : vector<2x256xf32>
    %c0_56 = arith.constant 0 : index
    %256 = memref.load %arg2[%c0_56] : memref<1xf32, #tpu.memory_space<smem>>
    %257 = vector.broadcast %256 : f32 to vector<2x256xf32>
    %258 = arith.addf %255, %257 : vector<2x256xf32>
    %259 = arith.negf %258 : vector<2x256xf32>
    %260 = math.exp %259 : vector<2x256xf32>
    %cst_57 = arith.constant 1.000000e+00 : f32
    %261 = vector.broadcast %cst_57 : f32 to vector<2x256xf32>
    %262 = arith.addf %261, %260 : vector<2x256xf32>
    %263 = arith.divf %261, %262 : vector<2x256xf32>
    %c0_58 = arith.constant 0 : index
    %c0_59 = arith.constant 0 : index
    %264 = vector.load %arg4[%c0_58, %c0_59] : memref<2x256xf32, #tpu.memory_space<vmem>>, vector<2x256xf32>
    tpu.vector_store %arg4[%c0_58, %c0_59], %263 {strides = array<i32>} : memref<2x256xf32, #tpu.memory_space<vmem>>, vector<2x256xf32>,
    return
  }
  func.func @transform_0(%arg0: i32) -> (i32, i32) {
    %c0_i32 = arith.constant 0 : i32
    %c0_i32_0 = arith.constant 0 : i32
    %c0_i32_1 = arith.constant 0 : i32
    return %c0_i32, %c0_i32_0 : i32, i32
  }
  func.func @transform_1(%arg0: i32) -> i32 {
    %c0_i32 = arith.constant 0 : i32
    %c0_i32_0 = arith.constant 0 : i32
    return %c0_i32 : i32
  }
  func.func @transform_2(%arg0: i32) -> (i32, i32, i32) {
    %c0_i32 = arith.constant 0 : i32
    %c0_i32_0 = arith.constant 0 : i32
    %c0_i32_1 = arith.constant 0 : i32
    return %arg0, %c0_i32, %c0_i32_0 : i32, i32, i32
  }
  func.func @transform_3(%arg0: i32) -> (i32, i32) {
    %c0_i32 = arith.constant 0 : i32
    %c0_i32_0 = arith.constant 0 : i32
    return %arg0, %c0_i32 : i32, i32
  }
}

</mosaic_0001>

<bundles_post_ra>
// kernel: tpu_custom_call.1
= control target key start
LH: loop header
LB: loop body
LE: loop exit
PB: predicated region body
PF: predicated region fallthrough
CT: control target
= control target key end

     0   :  { %9 = vsyncpa [#allocation4], 0  ;;  %s4889_s0 = inlined_call_operand.hbm [shape: f32[49,512], index: 0, kind: input, shape index: {}]   ;;  %s4890_s1 = inlined_call_operand.<no memory space> [shape: f32[1], index: 1, kind: input, shape index: {}]   ;;  %s4891_s2 = inlined_call_operand.hbm [shape: f32[2,4,256], index: 2, kind: input, shape index: {}]   ;;  %s4892_s3 = inlined_call_operand.hbm [shape: f32[2,256], index: 3, kind: output, shape index: {}]  }
   0x1   :  { %10 = vsyncpa [#allocation7], 0 }
   0x2   :  { %11 = vsyncpa [#allocation5], 0  ;;  %s2748_s12 = smov [#allocation3]   ;;  %s2676_s16 = scalar_lea.hbm %s4889_s0, 3584 }
   0x3   :  { %s17_s13 = sshll.u32 %s2748_s12, 4  ;;  %p2677_p0 = scmp.ne.s32.totalorder %s4889_s0, %s2676_s16  ;;  %s18_s13 = int_to_ptr.vmem [resolvable:$true] %s17_s13 }
   0x4   :  { %p2680_p1 = scmp.lt.u32.totalorder %s2676_s16, %s4889_s0 }
   0x6   :  { %p2682_p2 = pnand %p2680_p1, %p2677_p0 }
   0x8   :  { %2685 = shalt.err (!%p2682_p2)
}
   0x9   :  { %s2686_s21 = scalar_lea.vmem %s18_s13, 3584  ;;  %p2691_p4 = scmp.lt.s32.totalorder %s18_s13, %s18_s13 }
   0xa   :  { %p2687_p3 = scmp.ne.s32.totalorder %s18_s13, %s2686_s21  ;;  %p2692_p5 = scmp.lt.s32.totalorder %s2686_s21, %s2686_s21 }
   0xc   :  { %p2693_p6 = por %p2692_p5, %p2691_p4 }
   0xe   :  { %p2694_p7 = pnand %p2693_p6, %p2687_p3 }
  0x10   :  { %2697 = shalt.err (!%p2694_p7)
}
  0x11   :  { %s2749_s22 = smov 512   ;;  %s2750_s23 = smov 32  }
  0x12   :  { %23 = dma.hbm_to_vmem [thread:$0]  %s4889_s0, 3584, %s18_s13, [#allocation4], %s2749_s22, %s2749_s22, %s2750_s23  }
  0x13   :  { %s2751_s26 = smov [#allocation6]   ;;  %s2698_s30 = scalar_lea.hbm %s4891_s2, 256 }
  0x14   :  { %s31_s27 = sshll.u32 %s2751_s26, 4  ;;  %p2699_p8 = scmp.ne.s32.totalorder %s4891_s2, %s2698_s30  ;;  %s32_s27 = int_to_ptr.vmem [resolvable:$true] %s31_s27 }
  0x15   :  { %p2702_p9 = scmp.lt.u32.totalorder %s2698_s30, %s4891_s2 }
  0x17   :  { %p2704_p10 = pnand %p2702_p9, %p2699_p8 }
  0x19   :  { %2707 = shalt.err (!%p2704_p10)
}
  0x1a   :  { %s2708_s8 = scalar_lea.vmem %s32_s27, 256  ;;  %p2713_p12 = scmp.lt.s32.totalorder %s32_s27, %s32_s27 }
  0x1b   :  { %p2709_p11 = scmp.ne.s32.totalorder %s32_s27, %s2708_s8  ;;  %p2714_p13 = scmp.lt.s32.totalorder %s2708_s8, %s2708_s8 }
  0x1d   :  { %p2715_p0 = por %p2714_p13, %p2713_p12 }
  0x1f   :  { %p2716_p1 = pnand %p2715_p0, %p2709_p11 }
  0x21   :  { %2719 = shalt.err (!%p2716_p1)
}
  0x22   :  { %s2752_s0 = smov 128   ;;  %s2753_s9 = smov 8  }
  0x23   :  { %37 = dma.hbm_to_vmem [thread:$0]  %s4891_s2, 256, %s32_s27, [#allocation7], %s2752_s0, %s2752_s0, %s2753_s9  }
  0x24   :  { %2742 = dma.done.wait [#allocation4], 3584  }
  0x25   :  { %2743 = vsyncadd [#allocation4], 4294963712 }
  0x26   :  { %2744 = dma.done.wait [#allocation7], 256  }
  0x27   :  { %2745 = vsyncadd [#allocation7], 4294967040  ;;  %v4896_v0 = vmov 0.0   ;;  %s2755_s12 = smov 51   ;;  %s2756_s13 = smov 50   ;;  %vm52_vm0 = vcmask 1043456  }
  0x28   :  { %154 = vrot.lane.b32.xlu0 %v4896_v0, %s2755_s12  ;;  %204 = vrot.lane.b32.xlu1 %v4896_v0, %s2756_s13  ;;  %s2757_s14 = smov 49   ;;  %v44_v1 = vld [vmem:[#allocation6] sm:$0xff]  ;;  %v45_v2 = vld [vmem:[#allocation6 + $0x8] sm:$0xff]  ;;  %vm118_vm1 = vcmask 1041409   ;;  %s2758_s2 = smov 48   ;;  %vm214_vm2 = vcmask 408576  }
  0x29   :  { %v86_v3 = vsel %vm52_vm0, %v44_v1, -inf  ;;  %v100_v4 = vsel %vm52_vm0, %v45_v2, -inf  ;;  %v53_v5 = vsel %vm52_vm0, %v44_v1, 0.0  ;;  %v67_v6 = vsel %vm52_vm0, %v45_v2, 0.0  ;;  %s2759_s15 = smov 47   ;;  %s2760_s16 = smov 46  }
  0x2a   :  { %v87_v7 = vrot.slane %v86_v3, 4  ;;  %v101_v8 = vrot.slane %v100_v4, 4  ;;  %v54_v9 = vrot.slane %v53_v5, 4  ;;  %v68_v10 = vrot.slane %v67_v6, 4  ;;  %s2761_s17 = smov 45   ;;  %s2762_s18 = smov 35  }
  0x2b   :  { %v48_v11 = vcombine.high %v44_v1, %v44_v1  ;;  %v49_v12 = vcombine.high %v45_v2, %v45_v2  ;;  %s2763_s19 = smov 34   ;;  %s2764_s20 = smov 33   ;;  %vm164_vm3 = vcmask 416768   ;;  %vm264_vm4 = vcmask 400384  }
  0x2c   :  { %254 = vrot.lane.b32.xlu0 %v4896_v0, %s2757_s14  ;;  %v88_v13 = vmax.f32 %v86_v3, %v87_v7  ;;  %v102_v14 = vmax.f32 %v100_v4, %v101_v8  ;;  %v55_v15 = vadd.f32 %v54_v9, %v53_v5  ;;  %v69_v16 = vadd.f32 %v68_v10, %v67_v6  ;;  %s2765_s21 = smov 31   ;;  %s2766_s22 = smov 30  }
  0x2d   :  { %v93_v17 = vsel %vm52_vm0, %v48_v11, -inf  ;;  %v107_v18 = vsel %vm52_vm0, %v49_v12, -inf  ;;  %v60_v19 = vsel %vm52_vm0, %v48_v11, 0.0  ;;  %v74_v20 = vsel %vm52_vm0, %v49_v12, 0.0  ;;  %s2768_s24 = smov 19   ;;  %s2769_s25 = smov 18  }
  0x2e   :  { %v89_v21 = vrot.slane %v88_v13, 2  ;;  %v103_v22 = vrot.slane %v102_v14, 2  ;;  %v56_v23 = vrot.slane %v55_v15, 2  ;;  %v70_v24 = vrot.slane %v69_v16, 2  ;;  %s2770_s26 = smov 17   ;;  %s2771_s27 = smov 16  }
  0x2f   :  { %v94_v25 = vrot.slane %v93_v17, 4  ;;  %v108_v26 = vrot.slane %v107_v18, 4  ;;  %v61_v27 = vrot.slane %v60_v19, 4  ;;  %v75_v28 = vrot.slane %v74_v20, 4  ;;  %s2772_s28 = smov 15   ;;  %s2773_s29 = smov 14  }
  0x30   :  { %v90_v29 = vmax.f32 %v88_v13, %v89_v21  ;;  %v104_v30 = vmax.f32 %v102_v14, %v103_v22  ;;  %v57_v31 = vadd.f32 %v56_v23, %v55_v15  ;;  %v71_v32 = vadd.f32 %v70_v24, %v69_v16  ;;  %s2774_s30 = smov 13   ;;  %s2775_s4 = smov 3  }
  0x31   :  { %v95_v33 = vmax.f32 %v93_v17, %v94_v25  ;;  %v109_v34 = vmax.f32 %v107_v18, %v108_v26  ;;  %v62_v35 = vadd.f32 %v61_v27, %v60_v19  ;;  %v76_v36 = vadd.f32 %v75_v28, %v74_v20  ;;  %s2776_s5 = smov 2   ;;  %s2777_s6 = smov 1  }
  0x32   :  { %v91_v37 = vrot.slane %v90_v29, 1  ;;  %v105_v38 = vrot.slane %v104_v30, 1  ;;  %v58_v39 = vrot.slane %v57_v31, 1  ;;  %v72_v40 = vrot.slane %v71_v32, 1  ;;  %s2778_s7 = smov 127   ;;  %s2779_s8 = smov 126  }
  0x33   :  { %v96_v41 = vrot.slane %v95_v33, 2  ;;  %v110_v42 = vrot.slane %v109_v34, 2  ;;  %v63_v43 = vrot.slane %v62_v35, 2  ;;  %v77_v44 = vrot.slane %v76_v36, 2  ;;  %s2780_s0 = smov 125   ;;  %s2781_s9 = smov 115  }
  0x34   :  { %v92_v45 = vmax.f32 %v90_v29, %v91_v37  ;;  %v106_v46 = vmax.f32 %v104_v30, %v105_v38  ;;  %v59_v47 = vadd.f32 %v58_v39, %v57_v31  ;;  %v73_v48 = vadd.f32 %v72_v40, %v71_v32  ;;  %s2782_s10 = smov 114   ;;  %s2783_s11 = smov 113  }
  0x35   :  { %v97_v49 = vmax.f32 %v95_v33, %v96_v41  ;;  %v111_v50 = vmax.f32 %v109_v34, %v110_v42  ;;  %v64_v51 = vadd.f32 %v63_v43, %v62_v35  ;;  %v78_v52 = vadd.f32 %v77_v44, %v76_v36 }
  0x36   :  { %v2863_v53 = vsel %vm118_vm1, %v106_v46, %v92_v45  ;;  %v82_v54 = vmul.f32 0.25, %v59_v47  ;;  %v84_v55 = vmul.f32 0.25, %v73_v48  ;;  %vm314_vm5 = vcmask 392192  }
  0x37   :  { %210 = vrot.lane.b32.xlu0 %v2863_v53, %s2756_s13  ;;  %160 = vrot.lane.b32.xlu1 %v2863_v53, %s2755_s12  ;;  %v98_v56 = vrot.slane %v97_v49, 1  ;;  %v112_v57 = vrot.slane %v111_v50, 1  ;;  %v65_v59 = vrot.slane %v64_v51, 1  ;;  %v79_v60 = vrot.slane %v78_v52, 1 }
  0x38   :  { %v2870_v58 = vsel %vm118_vm1, %v84_v55, %v82_v54  ;;  %vm364_vm6 = vcmask 384000   ;;  %vm414_vm7 = vcmask 375808   ;;  %vm464_vm8 = vcmask 367616  }
  0x39   :  { %v99_v61 = vmax.f32 %v97_v49, %v98_v56  ;;  %v113_v62 = vmax.f32 %v111_v50, %v112_v57  ;;  %v66_v1 = vadd.f32 %v65_v59, %v64_v51  ;;  %v80_v2 = vadd.f32 %v79_v60, %v78_v52 }
  0x3a   :  { %vm514_vm9 = vcmask 285696   ;;  %vm564_vm10 = vcmask 277504   ;;  %vm614_vm11 = vcmask 269312   ;;  %vm664_vm12 = vcmask 261120  }
  0x3b   :  { %260 = vrot.lane.b32.xlu1 %v2863_v53, %s2757_s14  ;;  %156 = vrot.lane.b32.xlu0 %v2870_v58, %s2755_s12  ;;  %v2877_v63 = vsel %vm118_vm1, %v113_v62, %v99_v61  ;;  %v83_v3 = vmul.f32 0.25, %v66_v1  ;;  %v85_v4 = vmul.f32 0.25, %v80_v2  ;;  %vm714_vm13 = vcmask 252928  }
  0x3c   :  { %vm764_vm14 = vcmask 244736   ;;  %vm814_vm15 = vcmask 236544   ;;  %vm864_vm0 = vcmask 154624  }
  0x3d   :  { %v2888_v5 = vsel %vm118_vm1, %v85_v4, %v83_v3  ;;  %vm914_vm1 = vcmask 146432  }
  0x3f   :  { %212 = vrot.lane.b32.xlu1 %v2877_v63, %s2756_s13  ;;  %162 = vrot.lane.b32.xlu0 %v2877_v63, %s2755_s12 }
  0x43   :  { %256 = vrot.lane.b32.xlu1 %v2870_v58, %s2757_s14  ;;  %206 = vrot.lane.b32.xlu0 %v2870_v58, %s2756_s13 }
  0x47   :  { %258 = vrot.lane.b32.xlu0 %v2888_v5, %s2757_s14  ;;  %158 = vrot.lane.b32.xlu1 %v2888_v5, %s2755_s12  ;;  %s2784_s12 = smov 112  }
  0x4b   :  { %262 = vrot.lane.b32.xlu0 %v2877_v63, %s2757_s14  ;;  %208 = vrot.lane.b32.xlu1 %v2888_v5, %s2756_s13  ;;  %s2785_s13 = smov 111   ;;  %s2786_s14 = smov 110  }
  0x4f   :  { %306 = vrot.lane.b32.xlu0 %v2870_v58, %s2758_s2  ;;  %304 = vrot.lane.b32.xlu1 %v4896_v0, %s2758_s2 }
  0x53   :  { %310 = vrot.lane.b32.xlu0 %v2863_v53, %s2758_s2  ;;  %308 = vrot.lane.b32.xlu1 %v2888_v5, %s2758_s2 }
  0x57   :  { %354 = vrot.lane.b32.xlu0 %v4896_v0, %s2759_s15  ;;  %312 = vrot.lane.b32.xlu1 %v2877_v63, %s2758_s2  ;;  %s2787_s2 = smov 109  }
  0x5b   :  { %358 = vrot.lane.b32.xlu0 %v2888_v5, %s2759_s15  ;;  %356 = vrot.lane.b32.xlu1 %v2870_v58, %s2759_s15 }
  0x5f   :  { %362 = vrot.lane.b32.xlu0 %v2877_v63, %s2759_s15  ;;  %360 = vrot.lane.b32.xlu1 %v2863_v53, %s2759_s15  ;;  %s2788_s15 = smov 99  }
  0x63   :  { %406 = vrot.lane.b32.xlu0 %v2870_v58, %s2760_s16  ;;  %404 = vrot.lane.b32.xlu1 %v4896_v0, %s2760_s16 }
  0x67   :  { %410 = vrot.lane.b32.xlu0 %v2863_v53, %s2760_s16  ;;  %408 = vrot.lane.b32.xlu1 %v2888_v5, %s2760_s16 }
  0x6b   :  { %454 = vrot.lane.b32.xlu0 %v4896_v0, %s2761_s17  ;;  %412 = vrot.lane.b32.xlu1 %v2877_v63, %s2760_s16  ;;  %s2789_s16 = smov 98  }
  0x6f   :  { %458 = vrot.lane.b32.xlu0 %v2888_v5, %s2761_s17  ;;  %456 = vrot.lane.b32.xlu1 %v2870_v58, %s2761_s17 }
  0x73   :  { %462 = vrot.lane.b32.xlu0 %v2877_v63, %s2761_s17  ;;  %460 = vrot.lane.b32.xlu1 %v2863_v53, %s2761_s17  ;;  %s2790_s17 = smov 97  }
  0x77   :  { %506 = vrot.lane.b32.xlu0 %v2870_v58, %s2762_s18  ;;  %504 = vrot.lane.b32.xlu1 %v4896_v0, %s2762_s18 }
  0x7b   :  { %510 = vrot.lane.b32.xlu0 %v2863_v53, %s2762_s18  ;;  %508 = vrot.lane.b32.xlu1 %v2888_v5, %s2762_s18 }
  0x7f   :  { %554 = vrot.lane.b32.xlu0 %v4896_v0, %s2763_s19  ;;  %512 = vrot.lane.b32.xlu1 %v2877_v63, %s2762_s18  ;;  %s2791_s18 = smov 96  }
  0x83   :  { %558 = vrot.lane.b32.xlu0 %v2888_v5, %s2763_s19  ;;  %556 = vrot.lane.b32.xlu1 %v2870_v58, %s2763_s19 }
  0x87   :  { %562 = vrot.lane.b32.xlu0 %v2877_v63, %s2763_s19  ;;  %560 = vrot.lane.b32.xlu1 %v2863_v53, %s2763_s19  ;;  %s2792_s19 = smov 95  }
  0x8b   :  { %606 = vrot.lane.b32.xlu0 %v2870_v58, %s2764_s20  ;;  %604 = vrot.lane.b32.xlu1 %v4896_v0, %s2764_s20 }
  0x8f   :  { %610 = vrot.lane.b32.xlu0 %v2863_v53, %s2764_s20  ;;  %608 = vrot.lane.b32.xlu1 %v2888_v5, %s2764_s20 }
  0x93   :  { %654 = vrot.lane.b32.xlu0 %v4896_v0, %s2750_s23  ;;  %612 = vrot.lane.b32.xlu1 %v2877_v63, %s2764_s20  ;;  %s2793_s20 = smov 94  }
  0x97   :  { %658 = vrot.lane.b32.xlu0 %v2888_v5, %s2750_s23  ;;  %656 = vrot.lane.b32.xlu1 %v2870_v58, %s2750_s23 }
  0x9a   :  { %v2943_v6 = vpop.permute.xlu0 %154  ;;  %v2949_v7 = vpop.permute.xlu1 %204 }
  0x9b   :  { %662 = vrot.lane.b32.xlu0 %v2877_v63, %s2750_s23  ;;  %660 = vrot.lane.b32.xlu1 %v2863_v53, %s2750_s23  ;;  %s2767_s23 = smov 29  }
  0x9e   :  { %v2951_v8 = vpop.permute.xlu0 %254 }
  0x9f   :  { %706 = vrot.lane.b32.xlu0 %v2870_v58, %s2765_s21  ;;  %704 = vrot.lane.b32.xlu1 %v4896_v0, %s2765_s21 }
  0xa3   :  { %710 = vrot.lane.b32.xlu0 %v2863_v53, %s2765_s21  ;;  %708 = vrot.lane.b32.xlu1 %v2888_v5, %s2765_s21 }
  0xa7   :  { %754 = vrot.lane.b32.xlu0 %v4896_v0, %s2766_s22  ;;  %712 = vrot.lane.b32.xlu1 %v2877_v63, %s2765_s21  ;;  %s2794_s21 = smov 93  }
  0xa9   :  { %v2955_v9 = vpop.permute.xlu0 %210  ;;  %v2957_v10 = vpop.permute.xlu1 %160 }
  0xab   :  { %758 = vrot.lane.b32.xlu0 %v2888_v5, %s2766_s22  ;;  %756 = vrot.lane.b32.xlu1 %v2870_v58, %s2766_s22 }
  0xad   :  { %v2961_v11 = vpop.permute.xlu1 %260  ;;  %v2963_v12 = vpop.permute.xlu0 %156 }
  0xaf   :  { %762 = vrot.lane.b32.xlu0 %v2877_v63, %s2766_s22  ;;  %760 = vrot.lane.b32.xlu1 %v2863_v53, %s2766_s22  ;;  %s2795_s22 = smov 83  }
  0xb1   :  { %v2967_v13 = vpop.permute.xlu1 %212  ;;  %v2969_v14 = vpop.permute.xlu0 %162 }
  0xb3   :  { %806 = vrot.lane.b32.xlu0 %v2870_v58, %s2767_s23  ;;  %804 = vrot.lane.b32.xlu1 %v4896_v0, %s2767_s23 }
  0xb5   :  { %v2973_v15 = vpop.permute.xlu1 %256  ;;  %v2975_v16 = vpop.permute.xlu0 %206 }
  0xb7   :  { %810 = vrot.lane.b32.xlu0 %v2863_v53, %s2767_s23  ;;  %808 = vrot.lane.b32.xlu1 %v2888_v5, %s2767_s23 }
  0xb9   :  { %v2979_v17 = vpop.permute.xlu0 %258  ;;  %v2981_v18 = vpop.permute.xlu1 %158 }
  0xbb   :  { %854 = vrot.lane.b32.xlu0 %v4896_v0, %s2768_s24  ;;  %812 = vrot.lane.b32.xlu1 %v2877_v63, %s2767_s23  ;;  %s2796_s23 = smov 82  }
  0xbd   :  { %v2985_v19 = vpop.permute.xlu0 %262  ;;  %v2987_v20 = vpop.permute.xlu1 %208 }
  0xbf   :  { %858 = vrot.lane.b32.xlu0 %v2888_v5, %s2768_s24  ;;  %856 = vrot.lane.b32.xlu1 %v2870_v58, %s2768_s24 }
  0xc1   :  { %v2991_v21 = vpop.permute.xlu0 %306  ;;  %v2993_v22 = vpop.permute.xlu1 %304 }
  0xc3   :  { %862 = vrot.lane.b32.xlu0 %v2877_v63, %s2768_s24  ;;  %860 = vrot.lane.b32.xlu1 %v2863_v53, %s2768_s24  ;;  %s2797_s24 = smov 81  }
  0xc5   :  { %v2997_v23 = vpop.permute.xlu0 %310  ;;  %v2999_v24 = vpop.permute.xlu1 %308 }
  0xc7   :  { %906 = vrot.lane.b32.xlu0 %v2870_v58, %s2769_s25  ;;  %904 = vrot.lane.b32.xlu1 %v4896_v0, %s2769_s25 }
  0xc9   :  { %v3003_v25 = vpop.permute.xlu0 %354  ;;  %v3005_v26 = vpop.permute.xlu1 %312 }
  0xcb   :  { %910 = vrot.lane.b32.xlu0 %v2863_v53, %s2769_s25  ;;  %908 = vrot.lane.b32.xlu1 %v2888_v5, %s2769_s25 }
  0xcd   :  { %v3009_v27 = vpop.permute.xlu0 %358  ;;  %v3011_v28 = vpop.permute.xlu1 %356 }
  0xcf   :  { %954 = vrot.lane.b32.xlu0 %v4896_v0, %s2770_s26  ;;  %912 = vrot.lane.b32.xlu1 %v2877_v63, %s2769_s25  ;;  %s2798_s25 = smov 80  }
  0xd1   :  { %v3015_v29 = vpop.permute.xlu0 %362  ;;  %v3017_v30 = vpop.permute.xlu1 %360 }
  0xd3   :  { %958 = vrot.lane.b32.xlu0 %v2888_v5, %s2770_s26  ;;  %956 = vrot.lane.b32.xlu1 %v2870_v58, %s2770_s26 }
  0xd5   :  { %v3021_v31 = vpop.permute.xlu0 %406  ;;  %v3023_v32 = vpop.permute.xlu1 %404 }
  0xd7   :  { %962 = vrot.lane.b32.xlu0 %v2877_v63, %s2770_s26  ;;  %960 = vrot.lane.b32.xlu1 %v2863_v53, %s2770_s26  ;;  %s2799_s26 = smov 79  }
  0xd9   :  { %v3027_v33 = vpop.permute.xlu0 %410  ;;  %v3029_v34 = vpop.permute.xlu1 %408 }
  0xdb   :  { %1006 = vrot.lane.b32.xlu0 %v2870_v58, %s2771_s27  ;;  %1004 = vrot.lane.b32.xlu1 %v4896_v0, %s2771_s27 }
  0xdd   :  { %v3033_v35 = vpop.permute.xlu0 %454  ;;  %v3035_v36 = vpop.permute.xlu1 %412 }
  0xdf   :  { %1010 = vrot.lane.b32.xlu0 %v2863_v53, %s2771_s27  ;;  %1008 = vrot.lane.b32.xlu1 %v2888_v5, %s2771_s27 }
  0xe1   :  { %v3039_v37 = vpop.permute.xlu0 %458  ;;  %v3041_v38 = vpop.permute.xlu1 %456 }
  0xe3   :  { %1054 = vrot.lane.b32.xlu0 %v4896_v0, %s2772_s28  ;;  %1012 = vrot.lane.b32.xlu1 %v2877_v63, %s2771_s27  ;;  %s2800_s27 = smov 78  }
  0xe5   :  { %v3045_v39 = vpop.permute.xlu0 %462  ;;  %v3047_v40 = vpop.permute.xlu1 %460 }
  0xe7   :  { %1058 = vrot.lane.b32.xlu0 %v2888_v5, %s2772_s28  ;;  %1056 = vrot.lane.b32.xlu1 %v2870_v58, %s2772_s28 }
  0xe9   :  { %v3051_v41 = vpop.permute.xlu0 %506  ;;  %v3053_v42 = vpop.permute.xlu1 %504 }
  0xea   :  { %4950 = vst [vmem:[#allocation12_spill] sm:$0xff] %v3053_v42  ;;  %v3337_v42 = vld [vmem:[#allocation3 + $0x23] ss:$8 sm:$0xf] }
  0xeb   :  { %1062 = vrot.lane.b32.xlu0 %v2877_v63, %s2772_s28  ;;  %1060 = vrot.lane.b32.xlu1 %v2863_v53, %s2772_s28  ;;  %5011 = vst [vmem:[#allocation72_spill] sm:$0xff] %v3337_v42  ;;  %s2801_s28 = smov 77  }
  0xed   :  { %v3057_v43 = vpop.permute.xlu0 %510  ;;  %v3059_v44 = vpop.permute.xlu1 %508 }
  0xee   :  { %4951 = vst [vmem:[#allocation13_spill] sm:$0xff] %v3057_v43  ;;  %4952 = vst [vmem:[#allocation14_spill] sm:$0xff] %v3059_v44  ;;  %v168_v44 = vsel %vm164_vm3, %v2957_v10, %v2969_v14  ;;  %v217_v14 = vsel %vm214_vm2, %v2987_v20, %v2955_v9 }
  0xef   :  { %1106 = vrot.lane.b32.xlu0 %v2870_v58, %s2773_s29  ;;  %1104 = vrot.lane.b32.xlu1 %v4896_v0, %s2773_s29 }
  0xf1   :  { %v3063_v45 = vpop.permute.xlu0 %554  ;;  %v3065_v46 = vpop.permute.xlu1 %512 }
  0xf2   :  { %4953 = vst [vmem:[#allocation15_spill] sm:$0xff] %v3063_v45  ;;  %4954 = vst [vmem:[#allocation16_spill] sm:$0xff] %v3065_v46 }
  0xf3   :  { %1110 = vrot.lane.b32.xlu0 %v2863_v53, %s2773_s29  ;;  %1108 = vrot.lane.b32.xlu1 %v2888_v5, %s2773_s29 }
  0xf5   :  { %v3069_v47 = vpop.permute.xlu0 %558  ;;  %v3071_v48 = vpop.permute.xlu1 %556 }
  0xf6   :  { %4955 = vst [vmem:[#allocation17_spill] sm:$0xff] %v3069_v47  ;;  %4956 = vst [vmem:[#allocation18_spill] sm:$0xff] %v3071_v48  ;;  %v3279_v47 = vld [vmem:[#allocation3 + $0x7] ss:$8 sm:$0xf] }
  0xf7   :  { %1154 = vrot.lane.b32.xlu0 %v4896_v0, %s2774_s30  ;;  %1112 = vrot.lane.b32.xlu1 %v2877_v63, %s2773_s29  ;;  %v3315_v48 = vld [vmem:[#allocation3 + $0x22] ss:$8 sm:$0xf] }
  0xf8   :  { %5009 = vst [vmem:[#allocation70_spill] sm:$0xff] %v3315_v48 }
  0xf9   :  { %v3075_v49 = vpop.permute.xlu0 %562  ;;  %v3077_v50 = vpop.permute.xlu1 %560 }
  0xfa   :  { %4957 = vst [vmem:[#allocation19_spill] sm:$0xff] %v3075_v49  ;;  %4958 = vst [vmem:[#allocation20_spill] sm:$0xff] %v3077_v50  ;;  %v3243_v49 = vld [vmem:[#allocation3 + $0x4] ss:$8 sm:$0xf] }
  0xfb   :  { %1158 = vrot.lane.b32.xlu0 %v2888_v5, %s2774_s30  ;;  %1156 = vrot.lane.b32.xlu1 %v2870_v58, %s2774_s30 }
  0xfd   :  { %v3081_v51 = vpop.permute.xlu0 %606  ;;  %v3083_v52 = vpop.permute.xlu1 %604 }
  0xfe   :  { %4959 = vst [vmem:[#allocation21_spill] sm:$0xff] %v3081_v51  ;;  %4960 = vst [vmem:[#allocation22_spill] sm:$0xff] %v3083_v52  ;;  %v3255_v52 = vld [vmem:[#allocation3 + $0x5] ss:$8 sm:$0xf]  ;;  %v218_v51 = vsel %vm214_vm2, %v2955_v9, %v2967_v13  ;;  %v215_v13 = vsel %vm214_vm2, %v2949_v7, %v2975_v16 }
  0xff   :  { %1162 = vrot.lane.b32.xlu0 %v2877_v63, %s2774_s30  ;;  %1160 = vrot.lane.b32.xlu1 %v2863_v53, %s2774_s30  ;;  %v3398_v7 = vld [vmem:[#allocation3 + $0x26] ss:$8 sm:$0xf] }
 0x101   :  { %v3087_v54 = vpop.permute.xlu0 %610  ;;  %v3089_v55 = vpop.permute.xlu1 %608 }
 0x102   :  { %4961 = vst [vmem:[#allocation23_spill] sm:$0xff] %v3087_v54  ;;  %4962 = vst [vmem:[#allocation24_spill] sm:$0xff] %v3089_v55  ;;  %v3291_v54 = vld [vmem:[#allocation3 + $0x20] ss:$8 sm:$0xf] }
 0x103   :  { %1206 = vrot.lane.b32.xlu0 %v2870_v58, %s2775_s4  ;;  %1204 = vrot.lane.b32.xlu1 %v4896_v0, %s2775_s4 }
 0x105   :  { %v3093_v56 = vpop.permute.xlu0 %654  ;;  %v3095_v57 = vpop.permute.xlu1 %612 }
 0x106   :  { %4963 = vst [vmem:[#allocation25_spill] sm:$0xff] %v3093_v56  ;;  %4964 = vst [vmem:[#allocation26_spill] sm:$0xff] %v3095_v57 }
 0x107   :  { %1210 = vrot.lane.b32.xlu0 %v2863_v53, %s2775_s4  ;;  %1208 = vrot.lane.b32.xlu1 %v2888_v5, %s2775_s4 }
 0x109   :  { %v3099_v59 = vpop.permute.xlu0 %658  ;;  %v3101_v60 = vpop.permute.xlu1 %656 }
 0x10a   :  { %4965 = vst [vmem:[#allocation27_spill] sm:$0xff] %v3099_v59  ;;  %4966 = vst [vmem:[#allocation28_spill] sm:$0xff] %v3101_v60  ;;  %v3215_v60 = vld [vmem:[#allocation3 + $0x1] ss:$8 sm:$0xf] }
 0x10b   :  { %1254 = vrot.lane.b32.xlu0 %v4896_v0, %s2776_s5  ;;  %1212 = vrot.lane.b32.xlu1 %v2877_v63, %s2775_s4 }
 0x10d   :  { %v3105_v61 = vpop.permute.xlu0 %662  ;;  %v3107_v62 = vpop.permute.xlu1 %660 }
 0x10e   :  { %4967 = vst [vmem:[#allocation29_spill] sm:$0xff] %v3105_v61  ;;  %4968 = vst [vmem:[#allocation30_spill] sm:$0xff] %v3107_v62 }
 0x10f   :  { %1258 = vrot.lane.b32.xlu0 %v2888_v5, %s2776_s5  ;;  %1256 = vrot.lane.b32.xlu1 %v2870_v58, %s2776_s5 }
 0x111   :  { %v3111_v1 = vpop.permute.xlu0 %706  ;;  %v3113_v2 = vpop.permute.xlu1 %704 }
 0x112   :  { %4969 = vst [vmem:[#allocation31_spill] sm:$0xff] %v3111_v1  ;;  %4970 = vst [vmem:[#allocation32_spill] sm:$0xff] %v3113_v2 }
 0x113   :  { %1262 = vrot.lane.b32.xlu0 %v2877_v63, %s2776_s5  ;;  %1260 = vrot.lane.b32.xlu1 %v2863_v53, %s2776_s5 }
 0x115   :  { %v3117_v3 = vpop.permute.xlu0 %710  ;;  %v3119_v4 = vpop.permute.xlu1 %708 }
 0x116   :  { %4971 = vst [vmem:[#allocation33_spill] sm:$0xff] %v3117_v3  ;;  %4972 = vst [vmem:[#allocation34_spill] sm:$0xff] %v3119_v4 }
 0x117   :  { %1306 = vrot.lane.b32.xlu0 %v2870_v58, %s2777_s6  ;;  %1304 = vrot.lane.b32.xlu1 %v4896_v0, %s2777_s6 }
 0x119   :  { %v3123_v61 = vpop.permute.xlu0 %754  ;;  %v3125_v62 = vpop.permute.xlu1 %712 }
 0x11a   :  { %4973 = vst [vmem:[#allocation35_spill] sm:$0xff] %v3123_v61  ;;  %4974 = vst [vmem:[#allocation36_spill] sm:$0xff] %v3125_v62 }
 0x11b   :  { %1310 = vrot.lane.b32.xlu0 %v2863_v53, %s2777_s6  ;;  %1308 = vrot.lane.b32.xlu1 %v2888_v5, %s2777_s6 }
 0x11d   :  { %v3129_v2 = vpop.permute.xlu0 %758  ;;  %v3131_v1 = vpop.permute.xlu1 %756 }
 0x11e   :  { %4975 = vst [vmem:[#allocation37_spill] sm:$0xff] %v3129_v2  ;;  %4976 = vst [vmem:[#allocation38_spill] sm:$0xff] %v3131_v1  ;;  %v4981_v2 = vmov 0.0  }
 0x11f   :  { %1385 = vrot.lane.b32.xlu0 %v2870_v58, %s2778_s7  ;;  %1312 = vrot.lane.b32.xlu1 %v2877_v63, %s2777_s6 }
 0x121   :  { %v3135_v3 = vpop.permute.xlu0 %762  ;;  %v3137_v0 = vpop.permute.xlu1 %760 }
 0x122   :  { %4977 = vst [vmem:[#allocation39_spill] sm:$0xff] %v3135_v3  ;;  %4978 = vst [vmem:[#allocation40_spill] sm:$0xff] %v3137_v0 }
 0x123   :  { %1389 = vrot.lane.b32.xlu0 %v2863_v53, %s2778_s7  ;;  %1387 = vrot.lane.b32.xlu1 %v2888_v5, %s2778_s7 }
 0x125   :  { %v3141_v61 = vpop.permute.xlu0 %806  ;;  %v3143_v62 = vpop.permute.xlu1 %804 }
 0x126   :  { %4979 = vst [vmem:[#allocation41_spill] sm:$0xff] %v3141_v61  ;;  %4980 = vst [vmem:[#allocation42_spill] sm:$0xff] %v3143_v62 }
 0x127   :  { %1393 = vrot.lane.b32.xlu0 %v4981_v2, %s2778_s7  ;;  %1391 = vrot.lane.b32.xlu1 %v2877_v63, %s2778_s7 }
 0x129   :  { %v3147_v1 = vpop.permute.xlu0 %810  ;;  %v3149_v4 = vpop.permute.xlu1 %808 }
 0x12a   :  { %4982 = vst [vmem:[#allocation43_spill] sm:$0xff] %v3147_v1  ;;  %4983 = vst [vmem:[#allocation44_spill] sm:$0xff] %v3149_v4 }
 0x12b   :  { %1437 = vrot.lane.b32.xlu0 %v2888_v5, %s2779_s8  ;;  %1435 = vrot.lane.b32.xlu1 %v2870_v58, %s2779_s8 }
 0x12d   :  { %v3153_v3 = vpop.permute.xlu0 %854  ;;  %v3155_v0 = vpop.permute.xlu1 %812 }
 0x12e   :  { %4984 = vst [vmem:[#allocation45_spill] sm:$0xff] %v3153_v3  ;;  %4985 = vst [vmem:[#allocation46_spill] sm:$0xff] %v3155_v0 }
 0x12f   :  { %1441 = vrot.lane.b32.xlu0 %v2877_v63, %s2779_s8  ;;  %1439 = vrot.lane.b32.xlu1 %v2863_v53, %s2779_s8 }
 0x131   :  { %v3159_v62 = vpop.permute.xlu0 %858  ;;  %v3161_v61 = vpop.permute.xlu1 %856 }
 0x132   :  { %4986 = vst [vmem:[#allocation47_spill] sm:$0xff] %v3159_v62  ;;  %4987 = vst [vmem:[#allocation48_spill] sm:$0xff] %v3161_v61 }
 0x133   :  { %1485 = vrot.lane.b32.xlu0 %v2870_v58, %s2780_s0  ;;  %1443 = vrot.lane.b32.xlu1 %v4981_v2, %s2779_s8 }
 0x135   :  { %v3165_v1 = vpop.permute.xlu0 %862  ;;  %v3167_v4 = vpop.permute.xlu1 %860 }
 0x136   :  { %4988 = vst [vmem:[#allocation49_spill] sm:$0xff] %v3165_v1  ;;  %4989 = vst [vmem:[#allocation50_spill] sm:$0xff] %v3167_v4 }
 0x137   :  { %1489 = vrot.lane.b32.xlu0 %v2863_v53, %s2780_s0  ;;  %1487 = vrot.lane.b32.xlu1 %v2888_v5, %s2780_s0 }
 0x139   :  { %v3171_v3 = vpop.permute.xlu0 %906  ;;  %v3173_v0 = vpop.permute.xlu1 %904 }
 0x13a   :  { %4990 = vst [vmem:[#allocation51_spill] sm:$0xff] %v3171_v3  ;;  %4991 = vst [vmem:[#allocation52_spill] sm:$0xff] %v3173_v0 }
 0x13b   :  { %1493 = vrot.lane.b32.xlu0 %v4981_v2, %s2780_s0  ;;  %1491 = vrot.lane.b32.xlu1 %v2877_v63, %s2780_s0 }
 0x13d   :  { %v3177_v62 = vpop.permute.xlu0 %910  ;;  %v3179_v61 = vpop.permute.xlu1 %908 }
 0x13e   :  { %4992 = vst [vmem:[#allocation53_spill] sm:$0xff] %v3177_v62  ;;  %4993 = vst [vmem:[#allocation54_spill] sm:$0xff] %v3179_v61  ;;  %v133_v62 = vlaneseq }
 0x13f   :  { %1537 = vrot.lane.b32.xlu0 %v2888_v5, %s2781_s9  ;;  %1535 = vrot.lane.b32.xlu1 %v2870_v58, %s2781_s9 }
 0x141   :  { %v3183_v1 = vpop.permute.xlu0 %954  ;;  %v3185_v4 = vpop.permute.xlu1 %912 }
 0x142   :  { %4994 = vst [vmem:[#allocation55_spill] sm:$0xff] %v3183_v1  ;;  %4995 = vst [vmem:[#allocation56_spill] sm:$0xff] %v3185_v4  ;;  %v134_v1 = vshrl.u32 %v133_v62, 7  ;;  %v3219_v62 = vld [vmem:[#allocation3 + $0x2] ss:$8 sm:$0xf] }
 0x143   :  { %1541 = vrot.lane.b32.xlu0 %v2877_v63, %s2781_s9  ;;  %1539 = vrot.lane.b32.xlu1 %v2863_v53, %s2781_s9 }
 0x144   :  { %v3209_v56 = vsub.s32 3, %v134_v1 }
 0x145   :  { %v3189_v0 = vpop.permute.xlu0 %958  ;;  %v3191_v3 = vpop.permute.xlu1 %956 }
 0x146   :  { %4996 = vst [vmem:[#allocation57_spill] sm:$0xff] %v3189_v0  ;;  %4997 = vst [vmem:[#allocation58_spill] sm:$0xff] %v3191_v3  ;;  %v3207_v3 = vsub.s32 0, %v134_v1  ;;  %v5015_v45 = vrot.slane %v3215_v60, %v3209_v56 }
 0x147   :  { %1585 = vrot.lane.b32.xlu0 %v2870_v58, %s2782_s10  ;;  %1543 = vrot.lane.b32.xlu1 %v4981_v2, %s2781_s9 }
 0x148   :  { %v5017_v42 = vrot.slane %v3215_v60, %v3207_v3 }
 0x149   :  { %v3195_v61 = vpop.permute.xlu0 %962  ;;  %v3197_v59 = vpop.permute.xlu1 %960 }
 0x14a   :  { %4998 = vst [vmem:[#allocation59_spill] sm:$0xff] %v3195_v61  ;;  %4999 = vst [vmem:[#allocation60_spill] sm:$0xff] %v3197_v59  ;;  %v3213_v59 = vld [vmem:[#allocation3] ss:$8 sm:$0xf] }
 0x14b   :  { %1589 = vrot.lane.b32.xlu0 %v2863_v53, %s2782_s10  ;;  %1587 = vrot.lane.b32.xlu1 %v2888_v5, %s2782_s10  ;;  %v5019_v9 = vrot.slane %v3213_v59, %v3207_v3 }
 0x14d   :  { %v3201_v4 = vpop.permute.xlu0 %1006  ;;  %v3203_v0 = vpop.permute.xlu1 %1004 }
 0x14e   :  { %5000 = vst [vmem:[#allocation61_spill] sm:$0xff] %v3201_v4  ;;  %5001 = vst [vmem:[#allocation62_spill] sm:$0xff] %v3203_v0  ;;  %v3221_v4 = vsub.s32 1, %v134_v1  ;;  %v3223_v0 = vsub.s32 2, %v134_v1 }
 0x14f   :  { %1593 = vrot.lane.b32.xlu0 %v4981_v2, %s2782_s10  ;;  %1591 = vrot.lane.b32.xlu1 %v2877_v63, %s2782_s10  ;;  %v3303_v1 = vld [vmem:[#allocation3 + $0x21] ss:$8 sm:$0xf] }
 0x150   :  { %5008 = vst [vmem:[#allocation69_spill] sm:$0xff] %v3303_v1  ;;  %v3384_v1 = vld [vmem:[#allocation3 + $0x25] ss:$8 sm:$0xf] }
 0x151   :  { %v3211_v61 = vpop.permute.xlu0 %1010  ;;  %v3217_v57 = vpop.permute.xlu1 %1008 }
 0x152   :  { %5002 = vst [vmem:[#allocation63_spill] sm:$0xff] %v3211_v61  ;;  %5003 = vst [vmem:[#allocation64_spill] sm:$0xff] %v3217_v57  ;;  %v3233_v57 = vld [vmem:[#allocation3 + $0x3] ss:$8 sm:$0xf] }
 0x153   :  { %1637 = vrot.lane.b32.xlu0 %v2888_v5, %s2783_s11  ;;  %1635 = vrot.lane.b32.xlu1 %v2870_v58, %s2783_s11 }
 0x155   :  { %v3235_v55 = vpop.permute.xlu0 %1054  ;;  %v3245_v61 = vpop.permute.xlu1 %1012 }
 0x156   :  { %5004 = vst [vmem:[#allocation65_spill] sm:$0xff] %v3235_v55  ;;  %5005 = vst [vmem:[#allocation66_spill] sm:$0xff] %v3245_v61  ;;  %v3267_v61 = vld [vmem:[#allocation3 + $0x6] ss:$8 sm:$0xf] }
 0x157   :  { %1641 = vrot.lane.b32.xlu0 %v2877_v63, %s2783_s11  ;;  %1639 = vrot.lane.b32.xlu1 %v2863_v53, %s2783_s11 }
 0x159   :  { %v3281_v50 = vpop.permute.xlu0 %1058  ;;  %v3293_v46 = vpop.permute.xlu1 %1056 }
 0x15a   :  { %5006 = vst [vmem:[#allocation67_spill] sm:$0xff] %v3281_v50  ;;  %5007 = vst [vmem:[#allocation68_spill] sm:$0xff] %v3293_v46  ;;  %v3349_v46 = vld [vmem:[#allocation3 + $0x24] ss:$8 sm:$0xf] }
 0x15b   :  { %1685 = vrot.lane.b32.xlu0 %v2870_v58, %s2784_s12  ;;  %1643 = vrot.lane.b32.xlu1 %v4981_v2, %s2783_s11 }
 0x15d   :  { %v3327_v43 = vpop.permute.xlu0 %1062  ;;  %v3339_v55 = vpop.permute.xlu1 %1060 }
 0x15e   :  { %5010 = vst [vmem:[#allocation71_spill] sm:$0xff] %v3327_v43  ;;  %5012 = vst [vmem:[#allocation73_spill] sm:$0xff] %v3339_v55  ;;  %v165_v43 = vsel %vm164_vm3, %v2943_v6, %v2963_v12 }
 0x15f   :  { %1689 = vrot.lane.b32.xlu0 %v2863_v53, %s2784_s12  ;;  %1687 = vrot.lane.b32.xlu1 %v2888_v5, %s2784_s12 }
 0x161   :  { %v3374_v55 = vpop.permute.xlu0 %1106  ;;  %v3386_v50 = vpop.permute.xlu1 %1104 }
 0x162   :  { %5013 = vst [vmem:[#allocation74_spill] sm:$0xff] %v3374_v55  ;;  %5014 = vst [vmem:[#allocation75_spill] sm:$0xff] %v3386_v50  ;;  %v226_v55 = vmul.f32 %v218_v51, %v5015_v45  ;;  %v5016_v50 = vrot.slane %v3213_v59, %v3209_v56  ;;  %v223_v45 = vmul.f32 %v215_v13, %v5017_v42 }
 0x163   :  { %1693 = vrot.lane.b32.xlu0 %v4981_v2, %s2784_s12  ;;  %v216_v51 = vsel %vm214_vm2, %v2975_v16, %v2987_v20  ;;  %1691 = vrot.lane.b32.xlu1 %v2877_v63, %s2784_s12  ;;  %v173_v20 = vmul.f32 %v165_v43, %v5019_v9  ;;  %v166_v13 = vsel %vm164_vm3, %v2963_v12, %v2981_v18  ;;  %vm964_vm2 = vcmask 138240  }
 0x164   :  { %v176_v6 = vmul.f32 %v168_v44, %v5016_v50  ;;  %v167_v44 = vsel %vm164_vm3, %v2981_v18, %v2957_v10  ;;  %v265_v50 = vsel %vm264_vm4, %v2951_v8, %v2973_v15  ;;  %v268_v43 = vsel %vm264_vm4, %v2961_v11, %v2985_v19 }
 0x165   :  { %v3424_v16 = vpop.permute.xlu0 %1110  ;;  %v3437_v48 = vpop.permute.xlu1 %1108  ;;  %v5020_v12 = vrot.slane %v3215_v60, %v3221_v4  ;;  %v5021_v10 = vrot.slane %v3215_v60, %v3223_v0  ;;  %v266_v8 = vsel %vm264_vm4, %v2973_v15, %v2979_v17  ;;  %v267_v60 = vsel %vm264_vm4, %v2979_v17, %v2961_v11 }
 0x166   :  { %5018 = vst [vmem:[#allocation76_spill] sm:$0xff] %v3424_v16  ;;  %v230_v42 = vadd.f32 %v226_v55, %v176_v6  ;;  %v227_v16 = vadd.f32 %v223_v45, %v173_v20  ;;  %v5023_v55 = vrot.slane %v3213_v59, %v3223_v0  ;;  %v315_v15 = vsel %vm314_vm5, %v2993_v22, %v2991_v21 }
 0x167   :  { %v224_v9 = vmul.f32 %v216_v51, %v5020_v12  ;;  %v225_v18 = vmul.f32 %v217_v14, %v5021_v10  ;;  %1737 = vrot.lane.b32.xlu0 %v2888_v5, %s2785_s13  ;;  %1735 = vrot.lane.b32.xlu1 %v2870_v58, %s2785_s13  ;;  %v5022_v14 = vrot.slane %v3213_v59, %v3221_v4  ;;  %vm1014_vm3 = vcmask 130048  }
 0x168   :  { %v175_v6 = vmul.f32 %v167_v44, %v5023_v55  ;;  %v5024_v20 = vrot.slane %v3219_v62, %v3207_v3  ;;  %v5025_v11 = vrot.slane %v3219_v62, %v3209_v56  ;;  %v3484_v44 = vld [vmem:[#allocation3 + $0x27] ss:$8 sm:$0xf]  ;;  %vm1064_vm4 = vcmask 121856  }
 0x169   :  { %v174_v51 = vmul.f32 %v166_v13, %v5022_v14  ;;  %v3472_v45 = vpop.permute.xlu0 %1154  ;;  %v3486_v10 = vpop.permute.xlu1 %1112 }
 0x16a   :  { %v273_v12 = vmul.f32 %v265_v50, %v5024_v20  ;;  %v276_v17 = vmul.f32 %v268_v43, %v5025_v11  ;;  %v229_v14 = vadd.f32 %v225_v18, %v175_v6  ;;  %v316_v50 = vsel %vm314_vm5, %v2991_v21, %v2999_v24 }
 0x16b   :  { %v228_v22 = vadd.f32 %v224_v9, %v174_v51  ;;  %v317_v43 = vsel %vm314_vm5, %v2999_v24, %v2997_v23  ;;  %1741 = vrot.lane.b32.xlu0 %v2877_v63, %s2785_s13  ;;  %v5026_v20 = vrot.slane %v3219_v62, %v3221_v4  ;;  %v5027_v9 = vrot.slane %v3219_v62, %v3223_v0 }
 0x16c   :  { %v277_v55 = vadd.f32 %v273_v12, %v227_v16  ;;  %v5028_v21 = vrot.slane %v3233_v57, %v3207_v3  ;;  %1739 = vrot.lane.b32.xlu1 %v2863_v53, %s2785_s13  ;;  %v318_v24 = vsel %vm314_vm5, %v2997_v23, %v3005_v26  ;;  %v5029_v6 = vrot.slane %v3233_v57, %v3221_v4  ;;  %v5077_v16 = vld [vmem:[#allocation70_spill] sm:$0xff] }
 0x16d   :  { %v274_v11 = vmul.f32 %v266_v8, %v5026_v20  ;;  %v275_v18 = vmul.f32 %v267_v60, %v5027_v9  ;;  %v3516_v60 = vpop.permute.xlu0 %1158  ;;  %v5030_v12 = vrot.slane %v3233_v57, %v3223_v0  ;;  %v365_v23 = vsel %vm364_vm6, %v3003_v25, %v3011_v28  ;;  %v3530_v9 = vld [vmem:[#allocation3 + $0x40] ss:$8 sm:$0xf] }
 0x16e   :  { %v323_v51 = vmul.f32 %v315_v15, %v5028_v21  ;;  %v324_v15 = vmul.f32 %v316_v50, %v5029_v6  ;;  %v366_v26 = vsel %vm364_vm6, %v3011_v28, %v3009_v27  ;;  %v3532_v21 = vpop.permute.xlu1 %1156  ;;  %v280_v62 = vadd.f32 %v276_v17, %v230_v42  ;;  %v5076_v6 = vld [vmem:[#allocation30_spill] sm:$0xff] }
 0x16f   :  { %v325_v20 = vmul.f32 %v317_v43, %v5030_v12  ;;  %v278_v8 = vadd.f32 %v274_v11, %v228_v22  ;;  %v279_v50 = vadd.f32 %v275_v18, %v229_v14  ;;  %1785 = vrot.lane.b32.xlu0 %v2870_v58, %s2786_s14  ;;  %v5031_v43 = vrot.slane %v3233_v57, %v3209_v56  ;;  %v3560_v11 = vld [vmem:[#allocation3 + $0x41] ss:$8 sm:$0xf] }
 0x170   :  { %v327_v25 = vadd.f32 %v323_v51, %v277_v55  ;;  %v367_v12 = vsel %vm364_vm6, %v3009_v27, %v3017_v30  ;;  %v368_v42 = vsel %vm364_vm6, %v3017_v30, %v3015_v29  ;;  %1743 = vrot.lane.b32.xlu1 %v4981_v2, %s2785_s13  ;;  %v5032_v17 = vrot.slane %v3243_v49, %v3207_v3  ;;  %v5068_v27 = vld [vmem:[#allocation28_spill] sm:$0xff] }
 0x171   :  { %v326_v28 = vmul.f32 %v318_v24, %v5031_v43  ;;  %v5033_v14 = vrot.slane %v3243_v49, %v3221_v4  ;;  %v415_v55 = vsel %vm414_vm7, %v3023_v32, %v3021_v31  ;;  %v3562_v29 = vpop.permute.xlu0 %1162  ;;  %v328_v30 = vadd.f32 %v324_v15, %v278_v8  ;;  %v5067_v24 = vld [vmem:[#allocation26_spill] sm:$0xff] }
 0x172   :  { %v373_v22 = vmul.f32 %v365_v23, %v5032_v17  ;;  %v329_v18 = vadd.f32 %v325_v20, %v279_v50  ;;  %v3568_v23 = vpop.permute.xlu1 %1160  ;;  %v5034_v32 = vrot.slane %v3243_v49, %v3223_v0  ;;  %v5035_v43 = vrot.slane %v3243_v49, %v3209_v56 }
 0x173   :  { %v374_v57 = vmul.f32 %v366_v26, %v5033_v14  ;;  %v416_v8 = vsel %vm414_vm7, %v3021_v31, %v3029_v34  ;;  %v417_v15 = vsel %vm414_vm7, %v3029_v34, %v3027_v33  ;;  %1789 = vrot.lane.b32.xlu0 %v2863_v53, %s2786_s14  ;;  %v330_v20 = vadd.f32 %v326_v28, %v280_v62 }
 0x174   :  { %v375_v26 = vmul.f32 %v367_v12, %v5034_v32  ;;  %v376_v17 = vmul.f32 %v368_v42, %v5035_v43  ;;  %v5036_v50 = vrot.slane %v3255_v52, %v3207_v3  ;;  %1787 = vrot.lane.b32.xlu1 %v2888_v5, %s2786_s14  ;;  %v377_v31 = vadd.f32 %v373_v22, %v327_v25 }
 0x175   :  { %v378_v34 = vadd.f32 %v374_v57, %v328_v30  ;;  %v418_v14 = vsel %vm414_vm7, %v3027_v33, %v3035_v36  ;;  %v3598_v28 = vpop.permute.xlu0 %1206  ;;  %v5038_v43 = vrot.slane %v3255_v52, %v3223_v0  ;;  %v465_v25 = vsel %vm464_vm8, %v3033_v35, %v3041_v38  ;;  %v3612_v36 = vld [vmem:[#allocation3 + $0x42] ss:$8 sm:$0xf] }
 0x176   :  { %v423_v12 = vmul.f32 %v415_v55, %v5036_v50  ;;  %v5037_v55 = vrot.slane %v3255_v52, %v3221_v4  ;;  %v466_v33 = vsel %vm464_vm8, %v3041_v38, %v3039_v37  ;;  %v3614_v22 = vpop.permute.xlu1 %1204  ;;  %v379_v57 = vadd.f32 %v375_v26, %v329_v18 }
 0x177   :  { %v425_v50 = vmul.f32 %v417_v15, %v5038_v43  ;;  %v380_v30 = vadd.f32 %v376_v17, %v330_v20  ;;  %1793 = vrot.lane.b32.xlu0 %v4981_v2, %s2786_s14  ;;  %v5039_v38 = vrot.slane %v3255_v52, %v3209_v56  ;;  %v467_v43 = vsel %vm464_vm8, %v3039_v37, %v3047_v40 }
 0x178   :  { %v424_v32 = vmul.f32 %v416_v8, %v5037_v55  ;;  %v427_v35 = vadd.f32 %v423_v12, %v377_v31  ;;  %v468_v18 = vsel %vm464_vm8, %v3047_v40, %v3045_v39  ;;  %1791 = vrot.lane.b32.xlu1 %v2877_v63, %s2786_s14  ;;  %v5040_v26 = vrot.slane %v3267_v61, %v3207_v3  ;;  %v5042_v12 = vld [vmem:[#allocation12_spill] sm:$0xff]  ;;  %v5045_v8 = vld [vmem:[#allocation14_spill] sm:$0xff] }
 0x179   :  { %v426_v55 = vmul.f32 %v418_v14, %v5039_v38  ;;  %v5041_v20 = vrot.slane %v3267_v61, %v3221_v4  ;;  %v515_v31 = vsel %vm514_vm9, %v5042_v12, %v3051_v41  ;;  %v3644_v14 = vld [vmem:[#allocation3 + $0x43] ss:$8 sm:$0xf]  ;;  %v3646_v39 = vpop.permute.xlu0 %1210  ;;  %v429_v38 = vadd.f32 %v425_v50, %v379_v57 }
 0x17a   :  { %v473_v17 = vmul.f32 %v465_v25, %v5040_v26  ;;  %v428_v40 = vadd.f32 %v424_v32, %v378_v34  ;;  %v3652_v26 = vpop.permute.xlu1 %1208  ;;  %v5044_v37 = vrot.slane %v3267_v61, %v3209_v56  ;;  %v516_v34 = vsel %vm514_vm9, %v3051_v41, %v5045_v8  ;;  %v5046_v32 = vld [vmem:[#allocation13_spill] sm:$0xff] }
 0x17b   :  { %v474_v52 = vmul.f32 %v466_v33, %v5041_v20  ;;  %v5043_v20 = vrot.slane %v3267_v61, %v3223_v0  ;;  %v517_v50 = vsel %vm514_vm9, %v5045_v8, %v5046_v32  ;;  %1837 = vrot.lane.b32.xlu0 %v2888_v5, %s2787_s2  ;;  %v430_v57 = vadd.f32 %v426_v55, %v380_v30  ;;  %v3682_v55 = vld [vmem:[#allocation3 + $0x44] ss:$8 sm:$0xf] }
 0x17c   :  { %v476_v15 = vmul.f32 %v468_v18, %v5044_v37  ;;  %1835 = vrot.lane.b32.xlu1 %v2870_v58, %s2787_s2  ;;  %v477_v41 = vadd.f32 %v473_v17, %v427_v35  ;;  %v5048_v37 = vld [vmem:[#allocation16_spill] sm:$0xff]  ;;  %v5050_v61 = vrot.slane %v3279_v47, %v3223_v0  ;;  %v5051_v17 = vld [vmem:[#allocation18_spill] sm:$0xff]  ;;  %vm1114_vm5 = vcmask 113664  }
 0x17d   :  { %v475_v12 = vmul.f32 %v467_v43, %v5043_v20  ;;  %v5047_v43 = vrot.slane %v3279_v47, %v3207_v3  ;;  %v478_v8 = vadd.f32 %v474_v52, %v428_v40  ;;  %v518_v33 = vsel %vm514_vm9, %v5046_v32, %v5048_v37  ;;  %v5052_v52 = vld [vmem:[#allocation15_spill] sm:$0xff]  ;;  %v5053_v32 = vld [vmem:[#allocation17_spill] sm:$0xff] }
 0x17e   :  { %v525_v35 = vmul.f32 %v517_v50, %v5050_v61  ;;  %v565_v40 = vsel %vm564_vm10, %v5052_v52, %v5051_v17  ;;  %v566_v37 = vsel %vm564_vm10, %v5051_v17, %v5053_v32  ;;  %v3698_v30 = vpop.permute.xlu1 %1212  ;;  %v480_v62 = vadd.f32 %v476_v15, %v430_v57  ;;  %v5055_v52 = vld [vmem:[#allocation20_spill] sm:$0xff] }
 0x17f   :  { %v523_v20 = vmul.f32 %v515_v31, %v5047_v43  ;;  %v3684_v31 = vpop.permute.xlu0 %1254  ;;  %v5049_v43 = vrot.slane %v3279_v47, %v3221_v4  ;;  %v479_v25 = vadd.f32 %v475_v12, %v429_v38  ;;  %1841 = vrot.lane.b32.xlu0 %v2877_v63, %s2787_s2  ;;  %v5054_v61 = vrot.slane %v3279_v47, %v3209_v56  ;;  %v5058_v47 = vld [vmem:[#allocation19_spill] sm:$0xff] }
 0x180   :  { %v567_v17 = vsel %vm564_vm10, %v5053_v32, %v5055_v52  ;;  %1839 = vrot.lane.b32.xlu1 %v2863_v53, %s2787_s2  ;;  %v5056_v38 = vrot.slane %v3291_v54, %v3207_v3  ;;  %v5057_v57 = vrot.slane %v3291_v54, %v3221_v4  ;;  %v5060_v32 = vld [vmem:[#allocation22_spill] sm:$0xff]  ;;  %vm1164_vm6 = vcmask 105472  }
 0x181   :  { %v524_v18 = vmul.f32 %v516_v34, %v5049_v43  ;;  %v527_v50 = vadd.f32 %v523_v20, %v477_v41  ;;  %v526_v43 = vmul.f32 %v518_v33, %v5054_v61  ;;  %v568_v33 = vsel %vm564_vm10, %v5055_v52, %v5058_v47  ;;  %v5059_v41 = vld [vmem:[#allocation21_spill] sm:$0xff] }
 0x182   :  { %v573_v12 = vmul.f32 %v565_v40, %v5056_v38  ;;  %v574_v20 = vmul.f32 %v566_v37, %v5057_v57  ;;  %v615_v61 = vsel %vm614_vm11, %v5060_v32, %v5059_v41  ;;  %v529_v42 = vadd.f32 %v525_v35, %v479_v25  ;;  %v3734_v37 = vld [vmem:[#allocation3 + $0x45] ss:$8 sm:$0xf]  ;;  %v3736_v57 = vpop.permute.xlu1 %1256 }
 0x183   :  { %v3728_v15 = vpop.permute.xlu0 %1258  ;;  %v528_v34 = vadd.f32 %v524_v18, %v478_v8  ;;  %v5061_v52 = vrot.slane %v3291_v54, %v3223_v0  ;;  %v5062_v32 = vld [vmem:[#allocation24_spill] sm:$0xff]  ;;  %v5063_v18 = vld [vmem:[#allocation23_spill] sm:$0xff]  ;;  %1885 = vrot.lane.b32.xlu0 %v2870_v58, %s2788_s15  ;;  %v530_v35 = vadd.f32 %v526_v43, %v480_v62  ;;  %v5064_v38 = vrot.slane %v3291_v54, %v3209_v56  ;;  %v5069_v62 = vld [vmem:[#allocation25_spill] sm:$0xff] }
 0x184   :  { %v616_v49 = vsel %vm614_vm11, %v5059_v41, %v5062_v32  ;;  %v617_v25 = vsel %vm614_vm11, %v5062_v32, %v5063_v18  ;;  %v618_v32 = vsel %vm614_vm11, %v5063_v18, %v5067_v24  ;;  %1843 = vrot.lane.b32.xlu1 %v4981_v2, %s2787_s2  ;;  %v577_v8 = vadd.f32 %v573_v12, %v527_v50  ;;  %v5073_v18 = vld [vmem:[#allocation27_spill] sm:$0xff] }
 0x185   :  { %v575_v47 = vmul.f32 %v567_v17, %v5061_v52  ;;  %v576_v17 = vmul.f32 %v568_v33, %v5064_v38  ;;  %v5065_v52 = vld [vmem:[#allocation69_spill] sm:$0xff]  ;;  %v578_v51 = vadd.f32 %v574_v20, %v528_v34  ;;  %v665_v43 = vsel %vm664_vm12, %v5069_v62, %v5068_v27 }
 0x186   :  { %v5066_v40 = vrot.slane %v5065_v52, %v3207_v3  ;;  %v5072_v24 = vrot.slane %v5065_v52, %v3223_v0  ;;  %v666_v34 = vsel %vm664_vm12, %v5068_v27, %v5073_v18  ;;  %v3780_v12 = vld [vmem:[#allocation3 + $0x46] ss:$8 sm:$0xf]  ;;  %v3782_v20 = vpop.permute.xlu1 %1260  ;;  %v3784_v62 = vld [vmem:[#allocation3 + $0x60] ss:$8 sm:$0xf] }
 0x187   :  { %v3767_v33 = vpop.permute.xlu0 %1262  ;;  %5074 = vst [vmem:[#allocation14_spill] sm:$0xff] %v3780_v12  ;;  %v579_v54 = vadd.f32 %v575_v47, %v529_v42  ;;  %1889 = vrot.lane.b32.xlu0 %v2863_v53, %s2788_s15  ;;  %v5078_v42 = vrot.slane %v5077_v16, %v3207_v3  ;;  %v5081_v27 = vld [vmem:[#allocation29_spill] sm:$0xff]  ;;  %vm1214_vm7 = vcmask 23552   ;;  %vm1264_vm8 = vcmask 15360  }
 0x188   :  { %v623_v41 = vmul.f32 %v615_v61, %v5066_v40  ;;  %5070 = vst [vmem:[#allocation12_spill] sm:$0xff] %v3767_v33  ;;  %v5071_v61 = vrot.slane %v5065_v52, %v3221_v4  ;;  %v625_v38 = vmul.f32 %v617_v25, %v5072_v24  ;;  %v667_v25 = vsel %vm664_vm12, %v5073_v18, %v5076_v6  ;;  %v5103_v33 = vld [vmem:[#allocation39_spill] sm:$0xff]  ;;  %v5107_v12 = vld [vmem:[#allocation41_spill] sm:$0xff] }
 0x189   :  { %v580_v24 = vadd.f32 %v576_v17, %v530_v35  ;;  %v673_v47 = vmul.f32 %v665_v43, %v5078_v42  ;;  %1887 = vrot.lane.b32.xlu1 %v2888_v5, %s2788_s15  ;;  %v5080_v18 = vrot.slane %v5077_v16, %v3221_v4  ;;  %vm1314_vm9 = vcmask 7168  }
 0x18a   :  { %v624_v40 = vmul.f32 %v616_v49, %v5071_v61  ;;  %v5075_v49 = vrot.slane %v5065_v52, %v3209_v56  ;;  %v627_v50 = vadd.f32 %v623_v41, %v577_v8  ;;  %v668_v8 = vsel %vm664_vm12, %v5076_v6, %v5081_v27 }
 0x18b   :  { %v3813_v17 = vpop.permute.xlu0 %1306  ;;  %v1337_v41 = vrot.slane %v3784_v62, %v3207_v3  ;;  %v629_v42 = vadd.f32 %v625_v38, %v579_v54  ;;  %v5082_v52 = vrot.slane %v5077_v16, %v3223_v0  ;;  %1893 = vrot.lane.b32.xlu0 %v4981_v2, %s2788_s15  ;;  %vm1395_vm10 = vcmask 1039360  }
 0x18c   :  { %v626_v61 = vmul.f32 %v618_v32, %v5075_v49  ;;  %v3803_v32 = vld [vmem:[#allocation3 + $0x47] ss:$8 sm:$0xf]  ;;  %v674_v49 = vmul.f32 %v666_v34, %v5080_v18  ;;  %v628_v43 = vadd.f32 %v624_v40, %v578_v51  ;;  %v3822_v18 = vpop.permute.xlu1 %1304  ;;  %v677_v54 = vadd.f32 %v673_v47, %v627_v50 }
 0x18d   :  { %5079 = vst [vmem:[#allocation13_spill] sm:$0xff] %v3803_v32  ;;  %v675_v59 = vmul.f32 %v667_v25, %v5082_v52  ;;  %5083 = vst [vmem:[#allocation16_spill] sm:$0xff] %v3822_v18  ;;  %v5084_v40 = vrot.slane %v5077_v16, %v3209_v56  ;;  %v5085_v25 = vld [vmem:[#allocation31_spill] sm:$0xff]  ;;  %v5086_v52 = vld [vmem:[#allocation32_spill] sm:$0xff]  ;;  %1891 = vrot.lane.b32.xlu1 %v2877_v63, %s2788_s15  ;;  %v3843_v51 = vmul.f32 %v1337_v41, %v2870_v58  ;;  %vm1445_vm11 = vcmask 1031168  }
 0x18e   :  { %v630_v6 = vadd.f32 %v626_v61, %v580_v24  ;;  %v715_v61 = vsel %vm714_vm13, %v5086_v52, %v5085_v25  ;;  %v1341_v24 = vrot.slane %v3784_v62, %v3221_v4  ;;  %v678_v35 = vadd.f32 %v674_v49, %v628_v43  ;;  %v5090_v52 = vld [vmem:[#allocation33_spill] sm:$0xff]  ;;  %v5092_v34 = vld [vmem:[#allocation72_spill] sm:$0xff] }
 0x18f   :  { %v676_v38 = vmul.f32 %v668_v8, %v5084_v40  ;;  %5087 = vst [vmem:[#allocation18_spill] sm:$0xff] %v3843_v51  ;;  %v3845_v27 = vpop.permute.xlu0 %1310  ;;  %v679_v47 = vadd.f32 %v675_v59, %v629_v42  ;;  %v5089_v8 = vld [vmem:[#allocation34_spill] sm:$0xff]  ;;  %v1345_v43 = vrot.slane %v3784_v62, %v3223_v0  ;;  %v5093_v16 = vrot.slane %v5092_v34, %v3207_v3  ;;  %v5094_v50 = vld [vmem:[#allocation36_spill] sm:$0xff] }
 0x190   :  { %5088 = vst [vmem:[#allocation15_spill] sm:$0xff] %v3845_v27  ;;  %v716_v40 = vsel %vm714_vm13, %v5085_v25, %v5089_v8  ;;  %v717_v49 = vsel %vm714_vm13, %v5089_v8, %v5090_v52  ;;  %v3857_v41 = vpop.permute.xlu1 %1308  ;;  %v718_v59 = vsel %vm714_vm13, %v5090_v52, %v5094_v50  ;;  %v5095_v42 = vld [vmem:[#allocation38_spill] sm:$0xff]  ;;  %v5096_v25 = vld [vmem:[#allocation35_spill] sm:$0xff]  ;;  %1937 = vrot.lane.b32.xlu0 %v2888_v5, %s2789_s16  ;;  %v5097_v27 = vld [vmem:[#allocation37_spill] sm:$0xff]  ;;  %vm1495_vm12 = vcmask 1022976  }
 0x191   :  { %5091 = vst [vmem:[#allocation17_spill] sm:$0xff] %v3857_v41  ;;  %v723_v13 = vmul.f32 %v715_v61, %v5093_v16  ;;  %v765_v19 = vsel %vm764_vm14, %v5096_v25, %v5095_v42  ;;  %v1349_v8 = vrot.slane %v3784_v62, %v3209_v56  ;;  %v680_v51 = vadd.f32 %v676_v38, %v630_v6  ;;  %v3881_v50 = vld [vmem:[#allocation3 + $0x61] ss:$8 sm:$0xf] }
 0x192   :  { %v766_v61 = vsel %vm764_vm14, %v5095_v42, %v5097_v27  ;;  %1935 = vrot.lane.b32.xlu1 %v2870_v58, %s2789_s16  ;;  %5098 = vst [vmem:[#allocation20_spill] sm:$0xff] %v3881_v50  ;;  %v3884_v52 = vmul.f32 %v1341_v24, %v2888_v5  ;;  %v5100_v62 = vrot.slane %v5092_v34, %v3221_v4  ;;  %v5102_v25 = vld [vmem:[#allocation40_spill] sm:$0xff]  ;;  %v5141_v50 = vld [vmem:[#allocation57_spill] sm:$0xff]  ;;  %vm1545_vm13 = vcmask 941056  }
 0x193   :  { %v5101_v38 = vrot.slane %v5092_v34, %v3223_v0  ;;  %v767_v41 = vsel %vm764_vm14, %v5097_v27, %v5102_v25  ;;  %v768_v16 = vsel %vm764_vm14, %v5102_v25, %v5103_v33  ;;  %v3898_v32 = vpop.permute.xlu0 %1385  ;;  %v5105_v24 = vrot.slane %v5092_v34, %v3209_v56 }
 0x194   :  { %5099 = vst [vmem:[#allocation19_spill] sm:$0xff] %v3884_v52  ;;  %v724_v6 = vmul.f32 %v716_v40, %v5100_v62  ;;  %5104 = vst [vmem:[#allocation21_spill] sm:$0xff] %v3898_v32  ;;  %v5106_v40 = vrot.slane %v3349_v46, %v3207_v3  ;;  %v3909_v27 = vpop.permute.xlu1 %1312  ;;  %v3912_v18 = vmul.f32 %v1345_v43, %v2863_v53  ;;  %1941 = vrot.lane.b32.xlu0 %v2877_v63, %s2789_s16  ;;  %vm1595_vm14 = vcmask 932864  }
 0x195   :  { %v725_v42 = vmul.f32 %v717_v49, %v5101_v38  ;;  %v726_v52 = vmul.f32 %v718_v59, %v5105_v24  ;;  %v5108_v49 = vld [vmem:[#allocation42_spill] sm:$0xff]  ;;  %v727_v33 = vadd.f32 %v723_v13, %v677_v54  ;;  %v5110_v25 = vrot.slane %v3349_v46, %v3221_v4 }
 0x196   :  { %v773_v62 = vmul.f32 %v765_v19, %v5106_v40  ;;  %v815_v38 = vsel %vm814_vm15, %v5108_v49, %v5107_v12  ;;  %5109 = vst [vmem:[#allocation22_spill] sm:$0xff] %v3912_v18  ;;  %v3918_v59 = vmul.f32 %v1349_v8, %v2877_v63  ;;  %v3924_v24 = vld [vmem:[#allocation3 + $0x62] ss:$8 sm:$0xf]  ;;  %v5113_v43 = vrot.slane %v3349_v46, %v3223_v0 }
 0x197   :  { %v774_v34 = vmul.f32 %v766_v61, %v5110_v25  ;;  %5112 = vst [vmem:[#allocation23_spill] sm:$0xff] %v3924_v24  ;;  %v5114_v13 = vrot.slane %v3349_v46, %v3209_v56  ;;  %v5115_v61 = vld [vmem:[#allocation44_spill] sm:$0xff]  ;;  %1939 = vrot.lane.b32.xlu1 %v2863_v53, %s2789_s16  ;;  %v728_v25 = vadd.f32 %v724_v6, %v678_v35  ;;  %v5118_v6 = vld [vmem:[#allocation43_spill] sm:$0xff]  ;;  %v5122_v35 = vld [vmem:[#allocation45_spill] sm:$0xff] }
 0x198   :  { %5111 = vst [vmem:[#allocation24_spill] sm:$0xff] %v3918_v59  ;;  %v775_v40 = vmul.f32 %v767_v41, %v5113_v43  ;;  %v816_v8 = vsel %vm814_vm15, %v5107_v12, %v5115_v61  ;;  %v729_v19 = vadd.f32 %v725_v42, %v679_v47  ;;  %v5116_v59 = vrot.slane %v3384_v1, %v3207_v3  ;;  %v3942_v43 = vpop.permute.xlu0 %1389  ;;  %v3946_v12 = vpop.permute.xlu1 %1387 }
 0x199   :  { %v776_v54 = vmul.f32 %v768_v16, %v5114_v13  ;;  %5117 = vst [vmem:[#allocation69_spill] sm:$0xff] %v3942_v43  ;;  %v730_v16 = vadd.f32 %v726_v52, %v680_v51  ;;  %v777_v13 = vadd.f32 %v773_v62, %v727_v33  ;;  %v778_v47 = vadd.f32 %v774_v34, %v728_v25  ;;  %v3962_v52 = vld [vmem:[#allocation3 + $0x63] ss:$8 sm:$0xf] }
 0x19a   :  { %v823_v41 = vmul.f32 %v815_v38, %v5116_v59  ;;  %v817_v42 = vsel %vm814_vm15, %v5115_v61, %v5118_v6  ;;  %v5119_v38 = vrot.slane %v3384_v1, %v3221_v4  ;;  %1985 = vrot.lane.b32.xlu0 %v2870_v58, %s2790_s17  ;;  %v779_v62 = vadd.f32 %v775_v40, %v729_v19  ;;  %v5120_v34 = vld [vmem:[#allocation46_spill] sm:$0xff]  ;;  %v5123_v51 = vld [vmem:[#allocation47_spill] sm:$0xff] }
 0x19b   :  { %v780_v33 = vadd.f32 %v776_v54, %v730_v16  ;;  %v818_v61 = vsel %vm814_vm15, %v5118_v6, %v5120_v34  ;;  %1943 = vrot.lane.b32.xlu1 %v4981_v2, %s2789_s16  ;;  %v5125_v16 = vrot.slane %v3384_v1, %v3223_v0  ;;  %v5126_v34 = vld [vmem:[#allocation50_spill] sm:$0xff]  ;;  %v5129_v54 = vrot.slane %v3384_v1, %v3209_v56 }
 0x19c   :  { %v824_v59 = vmul.f32 %v816_v8, %v5119_v38  ;;  %v827_v25 = vadd.f32 %v823_v41, %v777_v13  ;;  %v5121_v38 = vld [vmem:[#allocation48_spill] sm:$0xff]  ;;  %v3977_v40 = vpop.permute.xlu0 %1393  ;;  %v867_v41 = vsel %vm864_vm0, %v5123_v51, %v5126_v34  ;;  %v5127_v13 = vld [vmem:[#allocation49_spill] sm:$0xff]  ;;  %v3990_v8 = vpop.permute.xlu1 %1391  ;;  %v5142_v43 = vrot.slane %v3484_v44, %v3207_v3 }
 0x19d   :  { %v865_v18 = vsel %vm864_vm0, %v5122_v35, %v5121_v38  ;;  %v866_v19 = vsel %vm864_vm0, %v5121_v38, %v5123_v51  ;;  %5124 = vst [vmem:[#allocation26_spill] sm:$0xff] %v3977_v40  ;;  %v825_v6 = vmul.f32 %v817_v42, %v5125_v16  ;;  %v868_v35 = vsel %vm864_vm0, %v5126_v34, %v5127_v13  ;;  %v5130_v42 = vld [vmem:[#allocation51_spill] sm:$0xff]  ;;  %v5131_v16 = vld [vmem:[#allocation52_spill] sm:$0xff]  ;;  %v5132_v51 = vld [vmem:[#allocation54_spill] sm:$0xff] }
 0x19e   :  { %5128 = vst [vmem:[#allocation28_spill] sm:$0xff] %v3990_v8  ;;  %v828_v46 = vadd.f32 %v824_v59, %v778_v47  ;;  %v826_v49 = vmul.f32 %v818_v61, %v5129_v54  ;;  %v915_v24 = vsel %vm914_vm1, %v5131_v16, %v5130_v42  ;;  %v916_v40 = vsel %vm914_vm1, %v5130_v42, %v5132_v51  ;;  %v5135_v59 = vld [vmem:[#allocation53_spill] sm:$0xff]  ;;  %v5136_v54 = vld [vmem:[#allocation56_spill] sm:$0xff]  ;;  %v5140_v38 = vld [vmem:[#allocation55_spill] sm:$0xff] }
 0x19f   :  { %1989 = vrot.lane.b32.xlu0 %v2863_v53, %s2790_s17  ;;  %v5133_v34 = vrot.slane %v3398_v7, %v3207_v3  ;;  %v5134_v47 = vrot.slane %v3398_v7, %v3221_v4  ;;  %v917_v61 = vsel %vm914_vm1, %v5132_v51, %v5135_v59  ;;  %v918_v16 = vsel %vm914_vm1, %v5135_v59, %v5136_v54 }
 0x1a0   :  { %1987 = vrot.lane.b32.xlu1 %v2888_v5, %s2790_s17  ;;  %v5137_v42 = vrot.slane %v3398_v7, %v3223_v0  ;;  %v4031_v54 = vpop.permute.xlu0 %1437  ;;  %v829_v8 = vadd.f32 %v825_v6, %v779_v62  ;;  %v923_v32 = vmul.f32 %v915_v24, %v5142_v43  ;;  %v5146_v6 = vrot.slane %v3484_v44, %v3209_v56  ;;  %v5147_v43 = vld [vmem:[#allocation59_spill] sm:$0xff] }
 0x1a1   :  { %v873_v13 = vmul.f32 %v865_v18, %v5133_v34  ;;  %v874_v1 = vmul.f32 %v866_v19, %v5134_v47  ;;  %v5138_v34 = vrot.slane %v3398_v7, %v3209_v56  ;;  %v5139_v47 = vld [vmem:[#allocation58_spill] sm:$0xff]  ;;  %vm1645_vm15 = vcmask 924672  }
 0x1a2   :  { %v875_v18 = vmul.f32 %v867_v41, %v5137_v42  ;;  %v965_v51 = vsel %vm964_vm2, %v5140_v38, %v5139_v47  ;;  %v966_v59 = vsel %vm964_vm2, %v5139_v47, %v5141_v50  ;;  %v5143_v41 = vrot.slane %v3484_v44, %v3221_v4  ;;  %v4042_v38 = vpop.permute.xlu1 %1435 }
 0x1a3   :  { %v876_v19 = vmul.f32 %v868_v35, %v5138_v34  ;;  %v5144_v35 = vld [vmem:[#allocation60_spill] sm:$0xff]  ;;  %v830_v34 = vadd.f32 %v826_v49, %v780_v33  ;;  %v5145_v47 = vrot.slane %v3484_v44, %v3223_v0  ;;  %v926_v24 = vmul.f32 %v918_v16, %v5146_v6  ;;  %1993 = vrot.lane.b32.xlu0 %v4981_v2, %s2790_s17 }
 0x1a4   :  { %v924_v7 = vmul.f32 %v916_v40, %v5143_v41  ;;  %v967_v42 = vsel %vm964_vm2, %v5141_v50, %v5144_v35  ;;  %v968_v40 = vsel %vm964_vm2, %v5144_v35, %v5147_v43  ;;  %v877_v50 = vadd.f32 %v873_v13, %v827_v25  ;;  %1991 = vrot.lane.b32.xlu1 %v2877_v63, %s2790_s17  ;;  %v4066_v43 = vpop.permute.xlu0 %1441 }
 0x1a5   :  { %v925_v62 = vmul.f32 %v917_v61, %v5145_v47  ;;  %v878_v41 = vadd.f32 %v874_v1, %v828_v46  ;;  %v5148_v49 = vrot.slane %v3530_v9, %v3207_v3  ;;  %v5149_v61 = vrot.slane %v3530_v9, %v3221_v4 }
 0x1a6   :  { %v879_v44 = vadd.f32 %v875_v18, %v829_v8  ;;  %v880_v16 = vadd.f32 %v876_v19, %v830_v34  ;;  %v5150_v35 = vrot.slane %v3530_v9, %v3223_v0  ;;  %v1472_v46 = vrot.slane %v3962_v52, %v3221_v4  ;;  %v4076_v18 = vpop.permute.xlu1 %1439 }
 0x1a7   :  { %v973_v33 = vmul.f32 %v965_v51, %v5148_v49  ;;  %v974_v47 = vmul.f32 %v966_v59, %v5149_v61  ;;  %v927_v25 = vadd.f32 %v923_v32, %v877_v50  ;;  %v928_v13 = vadd.f32 %v924_v7, %v878_v41  ;;  %v5152_v59 = vld [vmem:[#allocation61_spill] sm:$0xff]  ;;  %v5153_v49 = vld [vmem:[#allocation62_spill] sm:$0xff]  ;;  %2037 = vrot.lane.b32.xlu0 %v2888_v5, %s2791_s18 }
 0x1a8   :  { %v975_v6 = vmul.f32 %v967_v42, %v5150_v35  ;;  %v5151_v1 = vrot.slane %v3530_v9, %v3209_v56  ;;  %v1015_v8 = vsel %vm1014_vm3, %v5153_v49, %v5152_v59  ;;  %v929_v19 = vadd.f32 %v925_v62, %v879_v44  ;;  %v5154_v42 = vld [vmem:[#allocation64_spill] sm:$0xff]  ;;  %v5156_v62 = vld [vmem:[#allocation66_spill] sm:$0xff]  ;;  %2035 = vrot.lane.b32.xlu1 %v2870_v58, %s2791_s18 }
 0x1a9   :  { %v930_v34 = vadd.f32 %v926_v24, %v880_v16  ;;  %v1016_v61 = vsel %vm1014_vm3, %v5152_v59, %v5154_v42  ;;  %v977_v32 = vadd.f32 %v973_v33, %v927_v25  ;;  %v978_v7 = vadd.f32 %v974_v47, %v928_v13  ;;  %v5158_v35 = vld [vmem:[#allocation68_spill] sm:$0xff]  ;;  %v5160_v47 = vld [vmem:[#allocation67_spill] sm:$0xff]  ;;  %v4102_v13 = vpop.permute.xlu0 %1485 }
 0x1aa   :  { %v976_v51 = vmul.f32 %v968_v40, %v5151_v1  ;;  %v5155_v40 = vld [vmem:[#allocation63_spill] sm:$0xff]  ;;  %v979_v41 = vadd.f32 %v975_v6, %v929_v19  ;;  %v5157_v44 = vrot.slane %v3560_v11, %v3207_v3  ;;  %v5159_v1 = vld [vmem:[#allocation65_spill] sm:$0xff]  ;;  %v1066_v25 = vsel %vm1064_vm4, %v5158_v35, %v5160_v47 }
 0x1ab   :  { %v1017_v50 = vsel %vm1014_vm3, %v5154_v42, %v5155_v40  ;;  %v1018_v24 = vsel %vm1014_vm3, %v5155_v40, %v5156_v62  ;;  %v1065_v33 = vsel %vm1064_vm4, %v5159_v1, %v5158_v35  ;;  %v5161_v49 = vrot.slane %v3560_v11, %v3221_v4  ;;  %v5162_v19 = vld [vmem:[#allocation73_spill] sm:$0xff]  ;;  %v5163_v42 = vld [vmem:[#allocation71_spill] sm:$0xff]  ;;  %v4113_v62 = vpop.permute.xlu1 %1443  ;;  %v5166_v1 = vld [vmem:[#allocation74_spill] sm:$0xff]  ;;  %2041 = vrot.lane.b32.xlu0 %v2877_v63, %s2791_s18 }
 0x1ac   :  { %v1023_v16 = vmul.f32 %v1015_v8, %v5157_v44  ;;  %v980_v59 = vadd.f32 %v976_v51, %v930_v34  ;;  %v1067_v8 = vsel %vm1064_vm4, %v5160_v47, %v5162_v19  ;;  %v1068_v40 = vsel %vm1064_vm4, %v5162_v19, %v5163_v42  ;;  %v5170_v42 = vld [vmem:[#allocation76_spill] sm:$0xff]  ;;  %2039 = vrot.lane.b32.xlu1 %v2863_v53, %s2791_s18 }
 0x1ad   :  { %v1024_v6 = vmul.f32 %v1016_v61, %v5161_v49  ;;  %v5164_v44 = vrot.slane %v3560_v11, %v3223_v0  ;;  %v5165_v51 = vrot.slane %v3560_v11, %v3209_v56  ;;  %v5167_v61 = vld [vmem:[#allocation75_spill] sm:$0xff]  ;;  %v1116_v47 = vsel %vm1114_vm5, %v5166_v1, %v3437_v48 }
 0x1ae   :  { %v1115_v49 = vsel %vm1114_vm5, %v5167_v61, %v5166_v1  ;;  %v5168_v19 = vrot.slane %v3612_v36, %v3207_v3  ;;  %v5169_v11 = vrot.slane %v3612_v36, %v3221_v4  ;;  %v1027_v1 = vadd.f32 %v1023_v16, %v977_v32 }
 0x1af   :  { %v1025_v35 = vmul.f32 %v1017_v50, %v5164_v44  ;;  %v1026_v34 = vmul.f32 %v1018_v24, %v5165_v51  ;;  %v1117_v44 = vsel %vm1114_vm5, %v3437_v48, %v5170_v42  ;;  %v1118_v51 = vsel %vm1114_vm5, %v5170_v42, %v3486_v10  ;;  %2085 = vrot.lane.b32.xlu0 %v2870_v58, %s2792_s19 }
 0x1b0   :  { %v1073_v50 = vmul.f32 %v1065_v33, %v5168_v19  ;;  %v1074_v24 = vmul.f32 %v1066_v25, %v5169_v11  ;;  %v5171_v61 = vrot.slane %v3612_v36, %v3223_v0  ;;  %v5172_v19 = vrot.slane %v3612_v36, %v3209_v56  ;;  %v4152_v11 = vpop.permute.xlu0 %1489  ;;  %2043 = vrot.lane.b32.xlu1 %v4981_v2, %s2791_s18 }
 0x1b1   :  { %v1165_v48 = vsel %vm1164_vm6, %v3472_v45, %v3532_v21  ;;  %v1028_v9 = vadd.f32 %v1024_v6, %v978_v7  ;;  %v5173_v10 = vrot.slane %v3644_v14, %v3207_v3  ;;  %v5174_v32 = vrot.slane %v3644_v14, %v3221_v4 }
 0x1b2   :  { %v1075_v33 = vmul.f32 %v1067_v8, %v5171_v61  ;;  %v1076_v25 = vmul.f32 %v1068_v40, %v5172_v19  ;;  %v1166_v36 = vsel %vm1164_vm6, %v3532_v21, %v3516_v60  ;;  %v4163_v8 = vpop.permute.xlu1 %1487  ;;  %v1029_v40 = vadd.f32 %v1025_v35, %v979_v41 }
 0x1b3   :  { %v1123_v42 = vmul.f32 %v1115_v49, %v5173_v10  ;;  %v1124_v16 = vmul.f32 %v1116_v47, %v5174_v32  ;;  %v1030_v61 = vadd.f32 %v1026_v34, %v980_v59  ;;  %v5175_v45 = vrot.slane %v3644_v14, %v3223_v0  ;;  %v4173_v47 = vld [vmem:[#allocation3 + $0x64] ss:$8 sm:$0xf]  ;;  %2089 = vrot.lane.b32.xlu0 %v2863_v53, %s2792_s19 }
 0x1b4   :  { %v5176_v6 = vrot.slane %v3644_v14, %v3209_v56  ;;  %v1077_v19 = vadd.f32 %v1073_v50, %v1027_v1  ;;  %v1078_v21 = vadd.f32 %v1074_v24, %v1028_v9  ;;  %v5177_v41 = vrot.slane %v3682_v55, %v3207_v3  ;;  %v4188_v50 = vpop.permute.xlu0 %1493  ;;  %2087 = vrot.lane.b32.xlu1 %v2888_v5, %s2792_s19 }
 0x1b5   :  { %v1125_v7 = vmul.f32 %v1117_v44, %v5175_v45  ;;  %v1480_v35 = vrot.slane %v3962_v52, %v3209_v56  ;;  %v1079_v14 = vadd.f32 %v1075_v33, %v1029_v40  ;;  %v1080_v34 = vadd.f32 %v1076_v25, %v1030_v61 }
 0x1b6   :  { %v1126_v49 = vmul.f32 %v1118_v51, %v5176_v6  ;;  %v1173_v59 = vmul.f32 %v1165_v48, %v5177_v41  ;;  %v5178_v44 = vrot.slane %v3682_v55, %v3221_v4  ;;  %v1167_v9 = vsel %vm1164_vm6, %v3516_v60, %v3568_v23  ;;  %v4193_v10 = vpop.permute.xlu1 %1491 }
 0x1b7   :  { %v1127_v24 = vadd.f32 %v1123_v42, %v1077_v19  ;;  %v1128_v1 = vadd.f32 %v1124_v16, %v1078_v21  ;;  %v1215_v48 = vsel %vm1214_vm7, %v3614_v22, %v3598_v28  ;;  %v1518_v33 = vrot.slane %v4173_v47, %v3207_v3  ;;  %2093 = vrot.lane.b32.xlu0 %v4981_v2, %s2792_s19 }
 0x1b8   :  { %v1174_v51 = vmul.f32 %v1166_v36, %v5178_v44  ;;  %v1129_v25 = vadd.f32 %v1125_v7, %v1079_v14  ;;  %v1130_v32 = vadd.f32 %v1126_v49, %v1080_v34  ;;  %v1168_v60 = vsel %vm1164_vm6, %v3568_v23, %v3562_v29  ;;  %v4225_v7 = vpop.permute.xlu0 %1537  ;;  %v5187_v44 = vld [vmem:[#allocation12_spill] sm:$0xff]  ;;  %2091 = vrot.lane.b32.xlu1 %v2877_v63, %s2792_s19 }
 0x1b9   :  { %v1216_v42 = vsel %vm1214_vm7, %v3598_v28, %v3652_v26  ;;  %v1177_v22 = vadd.f32 %v1173_v59, %v1127_v24  ;;  %v5179_v16 = vrot.slane %v3682_v55, %v3223_v0  ;;  %v1217_v40 = vsel %vm1214_vm7, %v3652_v26, %v3646_v39 }
 0x1ba   :  { %v1265_v29 = vsel %vm1264_vm8, %v3684_v31, %v3736_v57  ;;  %v1178_v23 = vadd.f32 %v1174_v51, %v1128_v1  ;;  %v5180_v28 = vrot.slane %v3734_v37, %v3207_v3  ;;  %v1218_v45 = vsel %vm1214_vm7, %v3646_v39, %v3698_v30  ;;  %v5183_v39 = vld [vmem:[#allocation16_spill] sm:$0xff]  ;;  %v4239_v41 = vpop.permute.xlu1 %1535 }
 0x1bb   :  { %v1175_v36 = vmul.f32 %v1167_v9, %v5179_v16  ;;  %v1266_v26 = vsel %vm1264_vm8, %v3736_v57, %v3728_v15  ;;  %v5181_v31 = vrot.slane %v3682_v55, %v3209_v56  ;;  %v5182_v49 = vrot.slane %v3734_v37, %v3221_v4  ;;  %v5185_v55 = vld [vmem:[#allocation14_spill] sm:$0xff]  ;;  %v5188_v9 = vld [vmem:[#allocation17_spill] sm:$0xff]  ;;  %v5191_v16 = vld [vmem:[#allocation15_spill] sm:$0xff]  ;;  %2137 = vrot.lane.b32.xlu0 %v2888_v5, %s2793_s20 }
 0x1bc   :  { %v1223_v61 = vmul.f32 %v1215_v48, %v5180_v28  ;;  %v1267_v21 = vsel %vm1264_vm8, %v3728_v15, %v3782_v20  ;;  %v1315_v30 = vsel %vm1314_vm9, %v5183_v39, %v3813_v17  ;;  %v5184_v57 = vrot.slane %v3734_v37, %v3223_v0  ;;  %2135 = vrot.lane.b32.xlu1 %v2870_v58, %s2793_s20 }
 0x1bd   :  { %v1176_v6 = vmul.f32 %v1168_v60, %v5181_v31  ;;  %v1224_v19 = vmul.f32 %v1216_v42, %v5182_v49  ;;  %v5186_v14 = vrot.slane %v5185_v55, %v3207_v3  ;;  %v1268_v51 = vsel %vm1264_vm8, %v3782_v20, %v5187_v44 }
 0x1be   :  { %v1225_v59 = vmul.f32 %v1217_v40, %v5184_v57  ;;  %v1316_v15 = vsel %vm1314_vm9, %v3813_v17, %v5188_v9  ;;  %v1179_v24 = vadd.f32 %v1175_v36, %v1129_v25  ;;  %v5189_v1 = vrot.slane %v3734_v37, %v3209_v56  ;;  %v5193_v37 = vld [vmem:[#allocation13_spill] sm:$0xff]  ;;  %v4283_v39 = vpop.permute.xlu1 %1539 }
 0x1bf   :  { %v1273_v34 = vmul.f32 %v1265_v29, %v5186_v14  ;;  %v5190_v60 = vrot.slane %v5185_v55, %v3221_v4  ;;  %v1317_v20 = vsel %vm1314_vm9, %v5188_v9, %v5191_v16  ;;  %v1227_v17 = vadd.f32 %v1223_v61, %v1177_v22  ;;  %v5199_v9 = vld [vmem:[#allocation21_spill] sm:$0xff]  ;;  %2141 = vrot.lane.b32.xlu0 %v2877_v63, %s2793_s20 }
 0x1c0   :  { %v1226_v48 = vmul.f32 %v1218_v45, %v5189_v1  ;;  %v5192_v25 = vrot.slane %v5185_v55, %v3223_v0  ;;  %v5194_v40 = vrot.slane %v5193_v37, %v3207_v3  ;;  %v1318_v28 = vsel %vm1314_vm9, %v5191_v16, %v3909_v27  ;;  %v4275_v45 = vpop.permute.xlu0 %1541  ;;  %2139 = vrot.lane.b32.xlu1 %v2863_v53, %s2793_s20 }
 0x1c1   :  { %v1274_v42 = vmul.f32 %v1266_v26, %v5190_v60  ;;  %v1180_v26 = vadd.f32 %v1176_v6, %v1130_v32  ;;  %v1228_v31 = vadd.f32 %v1224_v19, %v1178_v23  ;;  %v5195_v49 = vrot.slane %v5185_v55, %v3209_v56  ;;  %v4292_v23 = vld [vmem:[#allocation3 + $0x65] ss:$8 sm:$0xf] }
 0x1c2   :  { %v1275_v36 = vmul.f32 %v1267_v21, %v5192_v25  ;;  %v1323_v29 = vmul.f32 %v1315_v30, %v5194_v40  ;;  %v5196_v61 = vrot.slane %v5193_v37, %v3221_v4  ;;  %v1229_v57 = vadd.f32 %v1225_v59, %v1179_v24  ;;  %v5200_v24 = vld [vmem:[#allocation69_spill] sm:$0xff] }
 0x1c3   :  { %v1276_v22 = vmul.f32 %v1268_v51, %v5195_v49  ;;  %v1277_v30 = vadd.f32 %v1273_v34, %v1227_v17  ;;  %v5197_v14 = vrot.slane %v5193_v37, %v3223_v0  ;;  %v1522_v32 = vrot.slane %v4173_v47, %v3221_v4  ;;  %v4315_v25 = vld [vmem:[#allocation3 + $0x66] ss:$8 sm:$0xf]  ;;  %2185 = vrot.lane.b32.xlu0 %v2870_v58, %s2794_s21 }
 0x1c4   :  { %v1324_v21 = vmul.f32 %v1316_v15, %v5196_v61  ;;  %v1230_v6 = vadd.f32 %v1226_v48, %v1180_v26  ;;  %v1278_v19 = vadd.f32 %v1274_v42, %v1228_v31  ;;  %v5198_v55 = vrot.slane %v5193_v37, %v3209_v56  ;;  %v4307_v48 = vpop.permute.xlu0 %1585  ;;  %v5201_v37 = vld [vmem:[#allocation28_spill] sm:$0xff]  ;;  %2143 = vrot.lane.b32.xlu1 %v4981_v2, %s2793_s20 }
 0x1c5   :  { %v1325_v27 = vmul.f32 %v1317_v20, %v5197_v14  ;;  %v1526_v34 = vrot.slane %v4173_v47, %v3223_v0  ;;  %v1279_v44 = vadd.f32 %v1275_v36, %v1229_v57  ;;  %v1327_v51 = vadd.f32 %v1323_v29, %v1277_v30  ;;  %v4311_v20 = vpop.permute.xlu1 %1543 }
 0x1c6   :  { %v1326_v59 = vmul.f32 %v1318_v28, %v5198_v55  ;;  %v1396_v15 = vsel %vm1395_vm10, %v5199_v9, %v3946_v12  ;;  %v1397_v1 = vsel %vm1395_vm10, %v3946_v12, %v5200_v24  ;;  %v1280_v60 = vadd.f32 %v1276_v22, %v1230_v6  ;;  %v5202_v28 = vld [vmem:[#allocation20_spill] sm:$0xff] }
 0x1c7   :  { %v1328_v42 = vadd.f32 %v1324_v21, %v1278_v19  ;;  %v1530_v16 = vrot.slane %v4173_v47, %v3209_v56  ;;  %v1568_v17 = vrot.slane %v4292_v23, %v3207_v3  ;;  %v1329_v36 = vadd.f32 %v1325_v27, %v1279_v44  ;;  %v5205_v21 = vld [vmem:[#allocation18_spill] sm:$0xff]  ;;  %v5206_v19 = vld [vmem:[#allocation19_spill] sm:$0xff]  ;;  %2189 = vrot.lane.b32.xlu0 %v2863_v53, %s2794_s21 }
 0x1c8   :  { %v1398_v12 = vsel %vm1395_vm10, %v5200_v24, %v5201_v37  ;;  %v1572_v40 = vrot.slane %v4292_v23, %v3221_v4  ;;  %v1330_v29 = vadd.f32 %v1326_v59, %v1280_v60  ;;  %v5203_v26 = vrot.slane %v5202_v28, %v3207_v3  ;;  %v1590_v14 = vpop.permute.xlu0 %1589  ;;  %v5207_v59 = vld [vmem:[#allocation26_spill] sm:$0xff]  ;;  %2187 = vrot.lane.b32.xlu1 %v2888_v5, %s2794_s21 }
 0x1c9   :  { %v5204_v49 = vrot.slane %v5202_v28, %v3221_v4  ;;  %v1576_v61 = vrot.slane %v4292_v23, %v3223_v0  ;;  %v1358_v57 = vadd.f32 %v5205_v21, %v1327_v51  ;;  %v1447_v30 = vsel %vm1445_vm11, %v4031_v54, %v4076_v18  ;;  %v4352_v24 = vpop.permute.xlu1 %1587  ;;  %v5211_v21 = vld [vmem:[#allocation23_spill] sm:$0xff] }
 0x1ca   :  { %v1404_v31 = vmul.f32 %v1396_v15, %v5203_v26  ;;  %v1580_v27 = vrot.slane %v4292_v23, %v3209_v56  ;;  %v1359_v55 = vadd.f32 %v5206_v19, %v1328_v42  ;;  %v1399_v44 = vsel %vm1395_vm10, %v5201_v37, %v5207_v59 }
 0x1cb   :  { %v1405_v22 = vmul.f32 %v1397_v1, %v5204_v49  ;;  %v5208_v51 = vrot.slane %v5202_v28, %v3223_v0  ;;  %v1448_v15 = vsel %vm1445_vm11, %v4076_v18, %v4066_v43  ;;  %v5209_v1 = vld [vmem:[#allocation22_spill] sm:$0xff]  ;;  %v1497_v42 = vsel %vm1495_vm12, %v4163_v8, %v4152_v11  ;;  %2193 = vrot.lane.b32.xlu0 %v4981_v2, %s2794_s21 }
 0x1cc   :  { %v1360_v60 = vadd.f32 %v5209_v1, %v1329_v36  ;;  %v1622_v37 = vrot.slane %v4315_v25, %v3221_v4  ;;  %v1408_v49 = vadd.f32 %v1404_v31, %v1358_v57  ;;  %v5212_v19 = vrot.slane %v5211_v21, %v3221_v4  ;;  %2191 = vrot.lane.b32.xlu1 %v2877_v63, %s2794_s21 }
 0x1cd   :  { %v1406_v9 = vmul.f32 %v1398_v12, %v5208_v51  ;;  %v5210_v12 = vld [vmem:[#allocation24_spill] sm:$0xff]  ;;  %v1409_v18 = vadd.f32 %v1405_v22, %v1359_v55  ;;  %v5213_v59 = vrot.slane %v5202_v28, %v3209_v56  ;;  %v5214_v1 = vrot.slane %v5211_v21, %v3223_v0  ;;  %v1594_v22 = vpop.permute.xlu0 %1593 }
 0x1ce   :  { %v1361_v26 = vadd.f32 %v5210_v12, %v1330_v29  ;;  %v1455_v36 = vmul.f32 %v1447_v30, %v5212_v19  ;;  %v1449_v29 = vsel %vm1445_vm11, %v4066_v43, %v4113_v62  ;;  %v1498_v31 = vsel %vm1495_vm12, %v4152_v11, %v4193_v10 }
 0x1cf   :  { %v1407_v51 = vmul.f32 %v1399_v44, %v5213_v59  ;;  %v1456_v6 = vmul.f32 %v1448_v15, %v5214_v1  ;;  %v1410_v57 = vadd.f32 %v1406_v9, %v1360_v60  ;;  %v1446_v30 = vsel %vm1445_vm11, %v4042_v38, %v4031_v54  ;;  %v1592_v44 = vpop.permute.xlu1 %1591  ;;  %2237 = vrot.lane.b32.xlu0 %v2888_v5, %s2795_s22 }
 0x1d0   :  { %v1505_v28 = vmul.f32 %v1497_v42, %v1472_v46  ;;  %v1547_v55 = vsel %vm1545_vm13, %v4225_v7, %v4283_v39  ;;  %v1499_v43 = vsel %vm1495_vm12, %v4193_v10, %v4188_v50  ;;  %v1548_v62 = vsel %vm1545_vm13, %v4283_v39, %v4275_v45  ;;  %2235 = vrot.lane.b32.xlu1 %v2870_v58, %s2795_s22 }
 0x1d1   :  { %v1598_v11 = vsel %vm1595_vm14, %v1590_v14, %v1592_v44  ;;  %v1599_v54 = vsel %vm1595_vm14, %v1592_v44, %v1594_v22  ;;  %v1459_v38 = vadd.f32 %v1455_v36, %v1409_v18  ;;  %v5215_v46 = vrot.slane %v5211_v21, %v3209_v56  ;;  %v1638_v19 = vpop.permute.xlu0 %1637 }
 0x1d2   :  { %v5216_v15 = vrot.slane %v3962_v52, %v3223_v0  ;;  %v1597_v10 = vsel %vm1595_vm14, %v4352_v24, %v1590_v14  ;;  %v1411_v39 = vadd.f32 %v1407_v51, %v1361_v26  ;;  %v5217_v60 = vrot.slane %v5211_v21, %v3207_v3 }
 0x1d3   :  { %v1457_v9 = vmul.f32 %v1449_v29, %v5215_v46  ;;  %v1460_v12 = vadd.f32 %v1456_v6, %v1410_v57  ;;  %v1555_v18 = vmul.f32 %v1547_v55, %v1522_v32  ;;  %v1496_v36 = vsel %vm1495_vm12, %v4102_v13, %v4163_v8  ;;  %v1636_v21 = vpop.permute.xlu1 %1635  ;;  %2241 = vrot.lane.b32.xlu0 %v2877_v63, %s2795_s22 }
 0x1d4   :  { %v1506_v50 = vmul.f32 %v1498_v31, %v5216_v15  ;;  %v1454_v42 = vmul.f32 %v1446_v30, %v5217_v60  ;;  %v1509_v59 = vadd.f32 %v1505_v28, %v1459_v38  ;;  %v1507_v14 = vmul.f32 %v1499_v43, %v1480_v35  ;;  %2239 = vrot.lane.b32.xlu1 %v2863_v53, %s2795_s22 }
 0x1d5   :  { %v1556_v26 = vmul.f32 %v1548_v62, %v1526_v34  ;;  %v1546_v6 = vsel %vm1545_vm13, %v4239_v41, %v4225_v7  ;;  %v1549_v32 = vsel %vm1545_vm13, %v4275_v45, %v4311_v20  ;;  %v1605_v51 = vmul.f32 %v1597_v10, %v1572_v40  ;;  %v1642_v40 = vpop.permute.xlu0 %1641 }
 0x1d6   :  { %v1646_v13 = vsel %vm1645_vm15, %v1636_v21, %v1638_v19  ;;  %v1461_v8 = vadd.f32 %v1457_v9, %v1411_v39  ;;  %v1510_v35 = vadd.f32 %v1506_v50, %v1460_v12  ;;  %v1606_v1 = vmul.f32 %v1598_v11, %v1576_v61 }
 0x1d7   :  { %v1626_v34 = vrot.slane %v4315_v25, %v3223_v0  ;;  %v1458_v7 = vadd.f32 %v1454_v42, %v1408_v49  ;;  %v5218_v41 = vrot.slane %v3962_v52, %v3207_v3  ;;  %v1559_v20 = vadd.f32 %v1555_v18, %v1509_v59  ;;  %v1640_v49 = vpop.permute.xlu1 %1639  ;;  %2285 = vrot.lane.b32.xlu0 %v2870_v58, %s2796_s23 }
 0x1d8   :  { %v1630_v29 = vrot.slane %v4315_v25, %v3209_v56  ;;  %v1511_v31 = vadd.f32 %v1507_v14, %v1461_v8  ;;  %v1554_v61 = vmul.f32 %v1546_v6, %v1518_v33  ;;  %v1560_v22 = vadd.f32 %v1556_v26, %v1510_v35  ;;  %2243 = vrot.lane.b32.xlu1 %v4981_v2, %s2795_s22  ;;  %v1713_v6 = vld [vmem:[#allocation3 + $0x80] ss:$8 sm:$0xf] }
 0x1d9   :  { %v1504_v45 = vmul.f32 %v1496_v36, %v5218_v41  ;;  %v1557_v57 = vmul.f32 %v1549_v32, %v1530_v16  ;;  %v1596_v52 = vsel %vm1595_vm14, %v4307_v48, %v4352_v24  ;;  %v1609_v30 = vadd.f32 %v1605_v51, %v1559_v20  ;;  %v1663_v48 = vld [vmem:[#allocation3 + $0x67] ss:$8 sm:$0xf]  ;;  %v1686_v43 = vpop.permute.xlu0 %1685 }
 0x1da   :  { %v1647_v28 = vsel %vm1645_vm15, %v1638_v19, %v1640_v49  ;;  %v1648_v55 = vsel %vm1645_vm15, %v1640_v49, %v1642_v40  ;;  %v1607_v33 = vmul.f32 %v1599_v54, %v1580_v27  ;;  %v1610_v47 = vadd.f32 %v1606_v1, %v1560_v22 }
 0x1db   :  { %v1655_v16 = vmul.f32 %v1647_v28, %v1622_v37  ;;  %v1656_v44 = vmul.f32 %v1648_v55, %v1626_v34  ;;  %v1508_v24 = vadd.f32 %v1504_v45, %v1458_v7  ;;  %v1561_v62 = vadd.f32 %v1557_v57, %v1511_v31  ;;  %v1644_v27 = vpop.permute.xlu1 %1643  ;;  %2289 = vrot.lane.b32.xlu0 %v2863_v53, %s2796_s23 }
 0x1dc   :  { %v1604_v11 = vmul.f32 %v1596_v52, %v1568_v17  ;;  %v1649_v54 = vsel %vm1645_vm15, %v1642_v40, %v1644_v27  ;;  %v1668_v37 = vrot.slane %v1663_v48, %v3207_v3  ;;  %v1672_v9 = vrot.slane %v1663_v48, %v3221_v4  ;;  %2287 = vrot.lane.b32.xlu1 %v2888_v5, %s2796_s23 }
 0x1dd   :  { %v1659_v38 = vadd.f32 %v1655_v16, %v1609_v30  ;;  %v1660_v46 = vadd.f32 %v1656_v44, %v1610_v47  ;;  %vm1695_vm0 = vcmask 916480   ;;  %v1558_v15 = vadd.f32 %v1554_v61, %v1508_v24  ;;  %v1690_v39 = vpop.permute.xlu0 %1689  ;;  %v1763_v44 = vld [vmem:[#allocation3 + $0x81] ss:$8 sm:$0xf] }
 0x1de   :  { %v1611_v50 = vadd.f32 %v1607_v33, %v1561_v62  ;;  %v5219_v10 = vrot.slane %v4315_v25, %v3207_v3  ;;  %v1657_v17 = vmul.f32 %v1649_v54, %v1630_v29  ;;  %v1676_v36 = vrot.slane %v1663_v48, %v3223_v0 }
 0x1df   :  { %v1608_v60 = vadd.f32 %v1604_v11, %v1558_v15  ;;  %v1688_v12 = vpop.permute.xlu1 %1687  ;;  %v1680_v26 = vrot.slane %v1663_v48, %v3209_v56  ;;  %v1718_v7 = vrot.slane %v1713_v6, %v3207_v3  ;;  %vm1745_vm1 = vcmask 908288   ;;  %2293 = vrot.lane.b32.xlu0 %v4981_v2, %s2796_s23 }
 0x1e0   :  { %v1654_v23 = vmul.f32 %v1646_v13, %v5219_v10  ;;  %v1661_v42 = vadd.f32 %v1657_v17, %v1611_v50  ;;  %v1696_v18 = vsel %vm1695_vm0, %v1686_v43, %v1688_v12  ;;  %v1697_v19 = vsel %vm1695_vm0, %v1688_v12, %v1690_v39  ;;  %2291 = vrot.lane.b32.xlu1 %v2877_v63, %s2796_s23 }
 0x1e1   :  { %v1704_v25 = vmul.f32 %v1696_v18, %v1668_v37  ;;  %v1705_v14 = vmul.f32 %v1697_v19, %v1672_v9  ;;  %v1694_v21 = vpop.permute.xlu0 %1693  ;;  %v1722_v61 = vrot.slane %v1713_v6, %v3221_v4  ;;  %v1726_v22 = vrot.slane %v1713_v6, %v3223_v0 }
 0x1e2   :  { %v1658_v59 = vadd.f32 %v1654_v23, %v1608_v60  ;;  %v1730_v47 = vrot.slane %v1713_v6, %v3209_v56  ;;  %vm1795_vm2 = vcmask 900096   ;;  %v1776_v23 = vrot.slane %v1763_v44, %v3223_v0  ;;  %v1813_v60 = vld [vmem:[#allocation3 + $0x82] ss:$8 sm:$0xf] }
 0x1e3   :  { %v1709_v51 = vadd.f32 %v1705_v14, %v1659_v38  ;;  %v1692_v13 = vpop.permute.xlu1 %1691  ;;  %2337 = vrot.lane.b32.xlu0 %v2888_v5, %s2797_s24  ;;  %v1768_v38 = vrot.slane %v1763_v44, %v3207_v3  ;;  %v1780_v17 = vrot.slane %v1763_v44, %v3209_v56  ;;  %v1818_v14 = vrot.slane %v1813_v60, %v3207_v3 }
 0x1e4   :  { %v1708_v32 = vadd.f32 %v1704_v25, %v1658_v59  ;;  %v1698_v8 = vsel %vm1695_vm0, %v1690_v39, %v1692_v13  ;;  %v1699_v35 = vsel %vm1695_vm0, %v1692_v13, %v1694_v21  ;;  %2335 = vrot.lane.b32.xlu1 %v2870_v58, %s2797_s24  ;;  %vm1845_vm3 = vcmask 891904  }
 0x1e5   :  { %v1706_v1 = vmul.f32 %v1698_v8, %v1676_v36  ;;  %v1707_v34 = vmul.f32 %v1699_v35, %v1680_v26  ;;  %v1738_v41 = vpop.permute.xlu0 %1737  ;;  %v1822_v8 = vrot.slane %v1813_v60, %v3221_v4  ;;  %v1826_v35 = vrot.slane %v1813_v60, %v3223_v0 }
 0x1e6   :  { %vm1895_vm4 = vcmask 809984   ;;  %vm1945_vm5 = vcmask 801792   ;;  %vm1995_vm6 = vcmask 793600   ;;  %vm2045_vm7 = vcmask 785408  }
 0x1e7   :  { %v1710_v45 = vadd.f32 %v1706_v1, %v1660_v46  ;;  %v1711_v20 = vadd.f32 %v1707_v34, %v1661_v42  ;;  %v1736_v40 = vpop.permute.xlu1 %1735  ;;  %2341 = vrot.lane.b32.xlu0 %v2877_v63, %s2797_s24  ;;  %v1772_v46 = vrot.slane %v1763_v44, %v3221_v4  ;;  %vm2095_vm8 = vcmask 777216  }
 0x1e8   :  { %v1746_v29 = vsel %vm1745_vm1, %v1736_v40, %v1738_v41  ;;  %2339 = vrot.lane.b32.xlu1 %v2863_v53, %s2797_s24  ;;  %vm2145_vm9 = vcmask 769024   ;;  %vm2195_vm10 = vcmask 760832   ;;  %vm2245_vm11 = vcmask 678912  }
 0x1e9   :  { %v1754_v31 = vmul.f32 %v1746_v29, %v1718_v7  ;;  %v1742_v57 = vpop.permute.xlu0 %1741  ;;  %v1830_v29 = vrot.slane %v1813_v60, %v3209_v56  ;;  %vm2295_vm12 = vcmask 670720   ;;  %vm2345_vm13 = vcmask 662528  }
 0x1ea   :  { %vm2395_vm14 = vcmask 654336   ;;  %vm2445_vm15 = vcmask 646144   ;;  %vm2495_vm0 = vcmask 637952  }
 0x1eb   :  { %v1758_v49 = vadd.f32 %v1754_v31, %v1708_v32  ;;  %v1740_v52 = vpop.permute.xlu1 %1739  ;;  %2385 = vrot.lane.b32.xlu0 %v2870_v58, %s2798_s25 }
 0x1ec   :  { %v1747_v30 = vsel %vm1745_vm1, %v1738_v41, %v1740_v52  ;;  %v1748_v28 = vsel %vm1745_vm1, %v1740_v52, %v1742_v57  ;;  %2343 = vrot.lane.b32.xlu1 %v4981_v2, %s2797_s24 }
 0x1ed   :  { %v1755_v55 = vmul.f32 %v1747_v30, %v1722_v61  ;;  %v1756_v33 = vmul.f32 %v1748_v28, %v1726_v22  ;;  %v1786_v16 = vpop.permute.xlu0 %1785  ;;  %v1863_v61 = vld [vmem:[#allocation3 + $0x83] ss:$8 sm:$0xf] }
 0x1ee   :  { %v1868_v28 = vrot.slane %v1863_v61, %v3207_v3 }
 0x1ef   :  { %v1759_v48 = vadd.f32 %v1755_v55, %v1709_v51  ;;  %v1760_v24 = vadd.f32 %v1756_v33, %v1710_v45  ;;  %v1744_v43 = vpop.permute.xlu1 %1743  ;;  %2389 = vrot.lane.b32.xlu0 %v2863_v53, %s2798_s25  ;;  %v1872_v55 = vrot.slane %v1863_v61, %v3221_v4 }
 0x1f0   :  { %v1749_v62 = vsel %vm1745_vm1, %v1742_v57, %v1744_v43  ;;  %2387 = vrot.lane.b32.xlu1 %v2888_v5, %s2798_s25  ;;  %vm2545_vm1 = vcmask 629760  }
 0x1f1   :  { %v1757_v11 = vmul.f32 %v1749_v62, %v1730_v47  ;;  %v1790_v27 = vpop.permute.xlu0 %1789  ;;  %v1876_v62 = vrot.slane %v1863_v61, %v3223_v0 }
 0x1f3   :  { %v1761_v54 = vadd.f32 %v1757_v11, %v1711_v20  ;;  %v1788_v37 = vpop.permute.xlu1 %1787  ;;  %2393 = vrot.lane.b32.xlu0 %v4981_v2, %s2798_s25  ;;  %v1880_v11 = vrot.slane %v1863_v61, %v3209_v56 }
 0x1f4   :  { %v1796_v9 = vsel %vm1795_vm2, %v1786_v16, %v1788_v37  ;;  %v1797_v15 = vsel %vm1795_vm2, %v1788_v37, %v1790_v27  ;;  %2391 = vrot.lane.b32.xlu1 %v2877_v63, %s2798_s25 }
 0x1f5   :  { %v1804_v50 = vmul.f32 %v1796_v9, %v1768_v38  ;;  %v1805_v10 = vmul.f32 %v1797_v15, %v1772_v46  ;;  %v1794_v39 = vpop.permute.xlu0 %1793  ;;  %v1913_v46 = vld [vmem:[#allocation3 + $0x84] ss:$8 sm:$0xf] }
 0x1f7   :  { %v1808_v42 = vadd.f32 %v1804_v50, %v1758_v49  ;;  %v1809_v12 = vadd.f32 %v1805_v10, %v1759_v48  ;;  %v1792_v18 = vpop.permute.xlu1 %1791  ;;  %2437 = vrot.lane.b32.xlu0 %v2888_v5, %s2799_s26 }
 0x1f8   :  { %v1798_v19 = vsel %vm1795_vm2, %v1790_v27, %v1792_v18  ;;  %v1799_v36 = vsel %vm1795_vm2, %v1792_v18, %v1794_v39  ;;  %2435 = vrot.lane.b32.xlu1 %v2870_v58, %s2799_s26 }
 0x1f9   :  { %v1806_v59 = vmul.f32 %v1798_v19, %v1776_v23  ;;  %v1807_v25 = vmul.f32 %v1799_v36, %v1780_v17  ;;  %v1838_v26 = vpop.permute.xlu0 %1837  ;;  %v1918_v23 = vrot.slane %v1913_v46, %v3207_v3  ;;  %v1922_v19 = vrot.slane %v1913_v46, %v3221_v4 }
 0x1fa   :  { %v1926_v36 = vrot.slane %v1913_v46, %v3223_v0 }
 0x1fb   :  { %v1810_v21 = vadd.f32 %v1806_v59, %v1760_v24  ;;  %v1811_v6 = vadd.f32 %v1807_v25, %v1761_v54  ;;  %v1836_v32 = vpop.permute.xlu1 %1835  ;;  %2441 = vrot.lane.b32.xlu0 %v2877_v63, %s2799_s26 }
 0x1fc   :  { %v1846_v51 = vsel %vm1845_vm3, %v1836_v32, %v1838_v26  ;;  %2439 = vrot.lane.b32.xlu1 %v2863_v53, %s2799_s26 }
 0x1fd   :  { %v1854_v13 = vmul.f32 %v1846_v51, %v1818_v14  ;;  %v1842_v1 = vpop.permute.xlu0 %1841  ;;  %v1930_v51 = vrot.slane %v1913_v46, %v3209_v56 }
 0x1ff   :  { %v1858_v34 = vadd.f32 %v1854_v13, %v1808_v42  ;;  %v1840_v7 = vpop.permute.xlu1 %1839  ;;  %2485 = vrot.lane.b32.xlu0 %v2870_v58, %s2800_s27 }
 0x200   :  { %v1847_v41 = vsel %vm1845_vm3, %v1838_v26, %v1840_v7  ;;  %v1848_v45 = vsel %vm1845_vm3, %v1840_v7, %v1842_v1  ;;  %2443 = vrot.lane.b32.xlu1 %v4981_v2, %s2799_s26 }
 0x201   :  { %v1855_v20 = vmul.f32 %v1847_v41, %v1822_v8  ;;  %v1856_v40 = vmul.f32 %v1848_v45, %v1826_v35  ;;  %v1886_v31 = vpop.permute.xlu0 %1885  ;;  %v1963_v8 = vld [vmem:[#allocation3 + $0x85] ss:$8 sm:$0xf] }
 0x202   :  { %v1972_v45 = vrot.slane %v1963_v8, %v3221_v4 }
 0x203   :  { %v1859_v22 = vadd.f32 %v1855_v20, %v1809_v12  ;;  %v1860_v57 = vadd.f32 %v1856_v40, %v1810_v21  ;;  %v1844_v49 = vpop.permute.xlu1 %1843  ;;  %2489 = vrot.lane.b32.xlu0 %v2863_v53, %s2800_s27 }
 0x204   :  { %v1849_v52 = vsel %vm1845_vm3, %v1842_v1, %v1844_v49  ;;  %2487 = vrot.lane.b32.xlu1 %v2888_v5, %s2800_s27  ;;  %v2013_v49 = vld [vmem:[#allocation3 + $0x86] ss:$8 sm:$0xf] }
 0x205   :  { %v1857_v30 = vmul.f32 %v1849_v52, %v1830_v29  ;;  %v1890_v33 = vpop.permute.xlu0 %1889  ;;  %v2026_v46 = vrot.slane %v2013_v49, %v3223_v0 }
 0x207   :  { %v1861_v47 = vadd.f32 %v1857_v30, %v1811_v6  ;;  %v1888_v16 = vpop.permute.xlu1 %1887  ;;  %2493 = vrot.lane.b32.xlu0 %v4981_v2, %s2800_s27 }
 0x208   :  { %v1896_v44 = vsel %vm1895_vm4, %v1886_v31, %v1888_v16  ;;  %v1897_v48 = vsel %vm1895_vm4, %v1888_v16, %v1890_v33  ;;  %2491 = vrot.lane.b32.xlu1 %v2877_v63, %s2800_s27 }
 0x209   :  { %v1904_v24 = vmul.f32 %v1896_v44, %v1868_v28  ;;  %v1905_v43 = vmul.f32 %v1897_v48, %v1872_v55  ;;  %v1894_v38 = vpop.permute.xlu0 %1893  ;;  %v2018_v44 = vrot.slane %v2013_v49, %v3207_v3 }
 0x20b   :  { %v1908_v27 = vadd.f32 %v1904_v24, %v1858_v34  ;;  %v1909_v54 = vadd.f32 %v1905_v43, %v1859_v22  ;;  %v1892_v37 = vpop.permute.xlu1 %1891  ;;  %2537 = vrot.lane.b32.xlu0 %v2888_v5, %s2801_s28  ;;  %v1968_v5 = vrot.slane %v1963_v8, %v3207_v3 }
 0x20c   :  { %v1898_v9 = vsel %vm1895_vm4, %v1890_v33, %v1892_v37  ;;  %v1899_v15 = vsel %vm1895_vm4, %v1892_v37, %v1894_v38  ;;  %2535 = vrot.lane.b32.xlu1 %v2870_v58, %s2801_s28  ;;  %v2022_v38 = vrot.slane %v2013_v49, %v3221_v4 }
 0x20d   :  { %v1906_v50 = vmul.f32 %v1898_v9, %v1876_v62  ;;  %v1907_v10 = vmul.f32 %v1899_v15, %v1880_v11  ;;  %v1938_v17 = vpop.permute.xlu0 %1937 }
 0x20f   :  { %v1910_v39 = vadd.f32 %v1906_v50, %v1860_v57  ;;  %v1911_v60 = vadd.f32 %v1907_v10, %v1861_v47  ;;  %v1936_v42 = vpop.permute.xlu1 %1935  ;;  %2541 = vrot.lane.b32.xlu0 %v2877_v63, %s2801_s28  ;;  %v1976_v63 = vrot.slane %v1963_v8, %v3223_v0 }
 0x210   :  { %v1946_v12 = vsel %vm1945_vm5, %v1936_v42, %v1938_v17  ;;  %2539 = vrot.lane.b32.xlu1 %v2863_v53, %s2801_s28  ;;  %v1980_v53 = vrot.slane %v1963_v8, %v3209_v56 }
 0x211   :  { %v1954_v18 = vmul.f32 %v1946_v12, %v1918_v23  ;;  %v1942_v59 = vpop.permute.xlu0 %1941  ;;  %v2030_v23 = vrot.slane %v2013_v49, %v3209_v56 }
 0x213   :  { %v1958_v25 = vadd.f32 %v1954_v18, %v1908_v27  ;;  %v1940_v14 = vpop.permute.xlu1 %1939 }
 0x214   :  { %v1947_v26 = vsel %vm1945_vm5, %v1938_v17, %v1940_v14  ;;  %v1948_v21 = vsel %vm1945_vm5, %v1940_v14, %v1942_v59  ;;  %2543 = vrot.lane.b32.xlu1 %v4981_v2, %s2801_s28 }
 0x215   :  { %v1955_v6 = vmul.f32 %v1947_v26, %v1922_v19  ;;  %v1956_v32 = vmul.f32 %v1948_v21, %v1926_v36  ;;  %v1986_v13 = vpop.permute.xlu0 %1985 }
 0x217   :  { %v1959_v35 = vadd.f32 %v1955_v6, %v1909_v54  ;;  %v1960_v1 = vadd.f32 %v1956_v32, %v1910_v39  ;;  %v1944_v34 = vpop.permute.xlu1 %1943  ;;  %v2063_v39 = vld [vmem:[#allocation3 + $0x87] ss:$8 sm:$0xf] }
 0x218   :  { %v1949_v7 = vsel %vm1945_vm5, %v1942_v59, %v1944_v34  ;;  %v2068_v36 = vrot.slane %v2063_v39, %v3207_v3  ;;  %v2072_v59 = vrot.slane %v2063_v39, %v3221_v4  ;;  %v2080_v8 = vrot.slane %v2063_v39, %v3209_v56 }
 0x219   :  { %v1957_v41 = vmul.f32 %v1949_v7, %v1930_v51  ;;  %v1990_v58 = vpop.permute.xlu0 %1989 }
 0x21b   :  { %v1961_v20 = vadd.f32 %v1957_v41, %v1911_v60  ;;  %v1988_v40 = vpop.permute.xlu1 %1987 }
 0x21c   :  { %v1996_v29 = vsel %vm1995_vm6, %v1986_v13, %v1988_v40  ;;  %v1997_v31 = vsel %vm1995_vm6, %v1988_v40, %v1990_v58  ;;  %v2076_v13 = vrot.slane %v2063_v39, %v3223_v0 }
 0x21d   :  { %v2004_v61 = vmul.f32 %v1996_v29, %v1968_v5  ;;  %v2005_v22 = vmul.f32 %v1997_v31, %v1972_v45  ;;  %v1994_v57 = vpop.permute.xlu0 %1993 }
 0x21f   :  { %v2008_v52 = vadd.f32 %v2004_v61, %v1958_v25  ;;  %v2009_v30 = vadd.f32 %v2005_v22, %v1959_v35  ;;  %v1992_v28 = vpop.permute.xlu1 %1991 }
 0x220   :  { %v1998_v55 = vsel %vm1995_vm6, %v1990_v58, %v1992_v28  ;;  %v1999_v33 = vsel %vm1995_vm6, %v1992_v28, %v1994_v57 }
 0x221   :  { %v2006_v47 = vmul.f32 %v1998_v55, %v1976_v63  ;;  %v2007_v16 = vmul.f32 %v1999_v33, %v1980_v53  ;;  %v2038_v48 = vpop.permute.xlu0 %2037 }
 0x223   :  { %v2010_v2 = vadd.f32 %v2006_v47, %v1960_v1  ;;  %v2011_v24 = vadd.f32 %v2007_v16, %v1961_v20  ;;  %v2036_v43 = vpop.permute.xlu1 %2035  ;;  %v2113_v1 = vld [vmem:[#allocation3 + $0xa0] ss:$8 sm:$0xf] }
 0x224   :  { %v2046_v62 = vsel %vm2045_vm7, %v2036_v43, %v2038_v48  ;;  %v2118_v40 = vrot.slane %v2113_v1, %v3207_v3  ;;  %v2122_v57 = vrot.slane %v2113_v1, %v3221_v4  ;;  %v2126_v49 = vrot.slane %v2113_v1, %v3223_v0 }
 0x225   :  { %v2054_v11 = vmul.f32 %v2046_v62, %v2018_v44  ;;  %v2042_v27 = vpop.permute.xlu0 %2041  ;;  %v2130_v44 = vrot.slane %v2113_v1, %v3209_v56 }
 0x227   :  { %v2058_v54 = vadd.f32 %v2054_v11, %v2008_v52  ;;  %v2040_v37 = vpop.permute.xlu1 %2039 }
 0x228   :  { %v2047_v9 = vsel %vm2045_vm7, %v2038_v48, %v2040_v37  ;;  %v2048_v15 = vsel %vm2045_vm7, %v2040_v37, %v2042_v27 }
 0x229   :  { %v2055_v50 = vmul.f32 %v2047_v9, %v2022_v38  ;;  %v2056_v10 = vmul.f32 %v2048_v15, %v2026_v46  ;;  %v2086_v17 = vpop.permute.xlu0 %2085 }
 0x22b   :  { %v2059_v60 = vadd.f32 %v2055_v50, %v2009_v30  ;;  %v2060_v42 = vadd.f32 %v2056_v10, %v2010_v2  ;;  %v2044_v12 = vpop.permute.xlu1 %2043 }
 0x22c   :  { %v2049_v18 = vsel %vm2045_vm7, %v2042_v27, %v2044_v12 }
 0x22d   :  { %v2057_v19 = vmul.f32 %v2049_v18, %v2030_v23  ;;  %v2090_v25 = vpop.permute.xlu0 %2089 }
 0x22f   :  { %v2061_v14 = vadd.f32 %v2057_v19, %v2011_v24  ;;  %v2088_v26 = vpop.permute.xlu1 %2087 }
 0x230   :  { %v2096_v21 = vsel %vm2095_vm8, %v2086_v17, %v2088_v26  ;;  %v2097_v6 = vsel %vm2095_vm8, %v2088_v26, %v2090_v25 }
 0x231   :  { %v2104_v32 = vmul.f32 %v2096_v21, %v2068_v36  ;;  %v2105_v51 = vmul.f32 %v2097_v6, %v2072_v59  ;;  %v2094_v35 = vpop.permute.xlu0 %2093  ;;  %v4636_v6 = vld [vmem:[#allocation3 + $0xa1] ss:$8 sm:$0xf] }
 0x232   :  { %v2172_v1 = vrot.slane %v4636_v6, %v3221_v4 }
 0x233   :  { %v2108_v34 = vadd.f32 %v2104_v32, %v2058_v54  ;;  %v2109_v7 = vadd.f32 %v2105_v51, %v2059_v60  ;;  %v2092_v41 = vpop.permute.xlu1 %2091  ;;  %v4638_v32 = vld [vmem:[#allocation3 + $0xa2] ss:$8 sm:$0xf] }
 0x234   :  { %v2098_v5 = vsel %vm2095_vm8, %v2090_v25, %v2092_v41  ;;  %v2099_v45 = vsel %vm2095_vm8, %v2092_v41, %v2094_v35  ;;  %v4654_v41 = vld [vmem:[#allocation3 + $0xa4] ss:$8 sm:$0xf] }
 0x235   :  { %v2106_v58 = vmul.f32 %v2098_v5, %v2076_v13  ;;  %v2107_v20 = vmul.f32 %v2099_v45, %v2080_v8  ;;  %v2138_v29 = vpop.permute.xlu0 %2137  ;;  %v2168_v13 = vrot.slane %v4636_v6, %v3207_v3  ;;  %v4644_v8 = vld [vmem:[#allocation3 + $0xa3] ss:$8 sm:$0xf]  ;;  %v2218_v5 = vrot.slane %v4638_v32, %v3207_v3 }
 0x236   :  { %v2222_v45 = vrot.slane %v4638_v32, %v3221_v4 }
 0x237   :  { %v2110_v31 = vadd.f32 %v2106_v58, %v2060_v42  ;;  %v2111_v61 = vadd.f32 %v2107_v20, %v2061_v14  ;;  %v2136_v22 = vpop.permute.xlu1 %2135  ;;  %v2226_v58 = vrot.slane %v4638_v32, %v3223_v0  ;;  %v4662_v20 = vld [vmem:[#allocation3 + $0xa5] ss:$8 sm:$0xf] }
 0x238   :  { %v2146_v63 = vsel %vm2145_vm9, %v2136_v22, %v2138_v29  ;;  %v2276_v22 = vrot.slane %v4644_v8, %v3223_v0 }
 0x239   :  { %v2154_v53 = vmul.f32 %v2146_v63, %v2118_v40  ;;  %v2142_v52 = vpop.permute.xlu0 %2141  ;;  %v2230_v40 = vrot.slane %v4638_v32, %v3209_v56  ;;  %v2280_v63 = vrot.slane %v4644_v8, %v3209_v56 }
 0x23b   :  { %v4582_v30 = vadd.f32 %v2154_v53, %v2108_v34  ;;  %v2140_v28 = vpop.permute.xlu1 %2139  ;;  %v2176_v34 = vrot.slane %v4636_v6, %v3223_v0  ;;  %v2318_v53 = vrot.slane %v4654_v41, %v3207_v3 }
 0x23c   :  { %v2147_v55 = vsel %vm2145_vm9, %v2138_v29, %v2140_v28  ;;  %v2148_v33 = vsel %vm2145_vm9, %v2140_v28, %v2142_v52  ;;  %v2268_v29 = vrot.slane %v4644_v8, %v3207_v3 }
 0x23d   :  { %v2155_v47 = vmul.f32 %v2147_v55, %v2122_v57  ;;  %v2156_v16 = vmul.f32 %v2148_v33, %v2126_v49  ;;  %v2186_v48 = vpop.permute.xlu0 %2185  ;;  %v4678_v57 = vld [vmem:[#allocation3 + $0xa6] ss:$8 sm:$0xf]  ;;  %v4709_v55 = vld [vmem:[#allocation3 + $0xc0] ss:$8 sm:$0xf] }
 0x23f   :  { %v4587_v2 = vadd.f32 %v2155_v47, %v2109_v7  ;;  %v4589_v24 = vadd.f32 %v2156_v16, %v2110_v31  ;;  %v2144_v43 = vpop.permute.xlu1 %2143  ;;  %v2180_v7 = vrot.slane %v4636_v6, %v3209_v56  ;;  %v2272_v31 = vrot.slane %v4644_v8, %v3221_v4  ;;  %v4690_v47 = vld [vmem:[#allocation3 + $0xa7] ss:$8 sm:$0xf] }
 0x240   :  { %v2149_v62 = vsel %vm2145_vm9, %v2142_v52, %v2144_v43 }
 0x241   :  { %v2157_v11 = vmul.f32 %v2149_v62, %v2130_v44  ;;  %v4592_v38 = vpop.permute.xlu0 %2189 }
 0x243   :  { %v4594_v46 = vadd.f32 %v2157_v11, %v2111_v61  ;;  %v2188_v27 = vpop.permute.xlu1 %2187 }
 0x244   :  { %v2196_v16 = vsel %vm2195_vm10, %v2186_v48, %v2188_v27  ;;  %v2197_v11 = vsel %vm2195_vm10, %v2188_v27, %v4592_v38  ;;  %v2468_v27 = vrot.slane %v4690_v47, %v3207_v3 }
 0x245   :  { %v4596_v54 = vpop.permute.xlu0 %2193  ;;  %v2204_v48 = vmul.f32 %v2196_v16, %v2168_v13  ;;  %v2205_v52 = vmul.f32 %v2197_v11, %v2172_v1  ;;  %v2526_v16 = vrot.slane %v4709_v55, %v3223_v0 }
 0x247   :  { %v4598_v37 = vpop.permute.xlu1 %2191 }
 0x248   :  { %v2198_v44 = vsel %vm2195_vm10, %v4592_v38, %v4598_v37  ;;  %v2199_v28 = vsel %vm2195_vm10, %v4598_v37, %v4596_v54 }
 0x249   :  { %v4600_v9 = vpop.permute.xlu0 %2237  ;;  %v2207_v11 = vmul.f32 %v2199_v28, %v2180_v7 }
 0x24b   :  { %v4602_v15 = vpop.permute.xlu1 %2235 }
 0x24c   :  { %v2246_v6 = vsel %vm2245_vm11, %v4602_v15, %v4600_v9 }
 0x24d   :  { %v4604_v50 = vpop.permute.xlu0 %2241 }
 0x24f   :  { %v4606_v10 = vpop.permute.xlu1 %2239 }
 0x250   :  { %v2247_v13 = vsel %vm2245_vm11, %v4600_v9, %v4606_v10  ;;  %v2248_v54 = vsel %vm2245_vm11, %v4606_v10, %v4604_v50  ;;  %v2206_v9 = vmul.f32 %v2198_v44, %v2176_v34  ;;  %v2209_v34 = vadd.f32 %v2205_v52, %v4587_v2 }
 0x251   :  { %v4608_v23 = vpop.permute.xlu0 %2285  ;;  %v2255_v33 = vmul.f32 %v2247_v13, %v2222_v45  ;;  %v2256_v7 = vmul.f32 %v2248_v54, %v2226_v58  ;;  %v2211_v45 = vadd.f32 %v2207_v11, %v4594_v46  ;;  %v2530_v58 = vrot.slane %v4709_v55, %v3209_v56 }
 0x252   :  { %v2210_v2 = vadd.f32 %v2206_v9, %v4589_v24 }
 0x253   :  { %v4610_v17 = vpop.permute.xlu1 %2243 }
 0x254   :  { %v2249_v37 = vsel %vm2245_vm11, %v4604_v50, %v4610_v17  ;;  %v2208_v50 = vadd.f32 %v2204_v48, %v4582_v30  ;;  %v2254_v17 = vmul.f32 %v2246_v6, %v2218_v5 }
 0x255   :  { %v4612_v39 = vpop.permute.xlu0 %2289  ;;  %v2257_v28 = vmul.f32 %v2249_v37, %v2230_v40 }
 0x256   :  { %v2258_v40 = vadd.f32 %v2254_v17, %v2208_v50  ;;  %v5224_v17 = vrot.slane %v4654_v41, %v3209_v56 }
 0x257   :  { %v4614_v60 = vpop.permute.xlu1 %2287 }
 0x258   :  { %v2296_v62 = vsel %vm2295_vm12, %v4608_v23, %v4614_v60  ;;  %v2297_v10 = vsel %vm2295_vm12, %v4614_v60, %v4612_v39 }
 0x259   :  { %v4616_v42 = vpop.permute.xlu0 %2293  ;;  %v2304_v60 = vmul.f32 %v2296_v62, %v2268_v29  ;;  %v2305_v44 = vmul.f32 %v2297_v10, %v2272_v31  ;;  %v2259_v29 = vadd.f32 %v2255_v33, %v2209_v34  ;;  %v5220_v31 = vrot.slane %v4654_v41, %v3221_v4 }
 0x25a   :  { %v2261_v33 = vadd.f32 %v2257_v28, %v2211_v45 }
 0x25b   :  { %v4618_v12 = vpop.permute.xlu1 %2291  ;;  %v2308_v8 = vadd.f32 %v2304_v60, %v2258_v40 }
 0x25c   :  { %v2298_v15 = vsel %vm2295_vm12, %v4612_v39, %v4618_v12  ;;  %v2299_v23 = vsel %vm2295_vm12, %v4618_v12, %v4616_v42 }
 0x25d   :  { %v4620_v18 = vpop.permute.xlu0 %2337  ;;  %v2306_v42 = vmul.f32 %v2298_v15, %v2276_v22  ;;  %v5222_v15 = vrot.slane %v4662_v20, %v3207_v3 }
 0x25f   :  { %v4622_v19 = vpop.permute.xlu1 %2335 }
 0x260   :  { %v2346_v30 = vsel %vm2345_vm13, %v4622_v19, %v4620_v18  ;;  %v2307_v19 = vmul.f32 %v2299_v23, %v2280_v63  ;;  %v2309_v63 = vadd.f32 %v2305_v44, %v2259_v29 }
 0x261   :  { %v4624_v36 = vpop.permute.xlu0 %2341  ;;  %v2354_v46 = vmul.f32 %v2346_v30, %v2318_v53  ;;  %v5221_v53 = vrot.slane %v4654_v41, %v3223_v0  ;;  %v5227_v41 = vrot.slane %v4678_v57, %v3223_v0 }
 0x262   :  { %v2311_v37 = vadd.f32 %v2307_v19, %v2261_v33 }
 0x263   :  { %v4626_v59 = vpop.permute.xlu1 %2339  ;;  %v2358_v50 = vadd.f32 %v2354_v46, %v2308_v8 }
 0x264   :  { %v2347_v5 = vsel %vm2345_vm13, %v4620_v18, %v4626_v59  ;;  %v2348_v24 = vsel %vm2345_vm13, %v4626_v59, %v4624_v36  ;;  %v2260_v18 = vadd.f32 %v2256_v7, %v2210_v2 }
 0x265   :  { %v4628_v25 = vpop.permute.xlu0 %2385  ;;  %v2355_v22 = vmul.f32 %v2347_v5, %v5220_v31  ;;  %v2356_v48 = vmul.f32 %v2348_v24, %v5221_v53 }
 0x266   :  { %v2310_v6 = vadd.f32 %v2306_v42, %v2260_v18 }
 0x267   :  { %v4630_v14 = vpop.permute.xlu1 %2343 }
 0x268   :  { %v2349_v13 = vsel %vm2345_vm13, %v4624_v36, %v4630_v14  ;;  %v2359_v36 = vadd.f32 %v2355_v22, %v2309_v63  ;;  %v2360_v44 = vadd.f32 %v2356_v48, %v2310_v6  ;;  %v5233_v6 = vrot.slane %v4690_v47, %v3221_v4 }
 0x269   :  { %v4632_v26 = vpop.permute.xlu0 %2389  ;;  %v2357_v34 = vmul.f32 %v2349_v13, %v5224_v17 }
 0x26b   :  { %v4634_v21 = vpop.permute.xlu1 %2387  ;;  %v2361_v46 = vadd.f32 %v2357_v34, %v2311_v37 }
 0x26c   :  { %v2396_v52 = vsel %vm2395_vm14, %v4628_v25, %v4634_v21  ;;  %v2397_v25 = vsel %vm2395_vm14, %v4634_v21, %v4632_v26 }
 0x26d   :  { %v4640_v51 = vpop.permute.xlu0 %2393  ;;  %v2404_v9 = vmul.f32 %v2396_v52, %v5222_v15 }
 0x26f   :  { %v4646_v35 = vpop.permute.xlu1 %2391  ;;  %v2408_v45 = vadd.f32 %v2404_v9, %v2358_v50 }
 0x270   :  { %v2398_v59 = vsel %vm2395_vm14, %v4632_v26, %v4646_v35  ;;  %v2399_v14 = vsel %vm2395_vm14, %v4646_v35, %v4640_v51  ;;  %v5223_v26 = vrot.slane %v4662_v20, %v3223_v0  ;;  %v5226_v51 = vrot.slane %v4678_v57, %v3207_v3 }
 0x271   :  { %v4670_v61 = vpop.permute.xlu0 %2437 }
 0x272   :  { %v2406_v21 = vmul.f32 %v2398_v59, %v5223_v26 }
 0x273   :  { %v4680_v49 = vpop.permute.xlu1 %2435 }
 0x274   :  { %v2446_v11 = vsel %vm2445_vm15, %v4680_v49, %v4670_v61  ;;  %v5225_v49 = vrot.slane %v4662_v20, %v3221_v4  ;;  %v2410_v19 = vadd.f32 %v2406_v21, %v2360_v44 }
 0x275   :  { %v4703_v32 = vpop.permute.xlu0 %2441  ;;  %v2454_v35 = vmul.f32 %v2446_v11, %v5226_v51  ;;  %v5235_v11 = vrot.slane %v4709_v55, %v3221_v4 }
 0x276   :  { %v2405_v7 = vmul.f32 %v2397_v25, %v5225_v49  ;;  %v5234_v25 = vrot.slane %v4690_v47, %v3209_v56 }
 0x277   :  { %v4711_v43 = vpop.permute.xlu1 %2439  ;;  %v2458_v52 = vadd.f32 %v2454_v35, %v2408_v45 }
 0x278   :  { %v2448_v10 = vsel %vm2445_vm15, %v4711_v43, %v4703_v32  ;;  %v2447_v30 = vsel %vm2445_vm15, %v4670_v61, %v4711_v43  ;;  %v5229_v43 = vrot.slane %v4690_v47, %v3223_v0  ;;  %v2409_v31 = vadd.f32 %v2405_v7, %v2359_v36 }
 0x279   :  { %v2486_v1 = vpop.permute.xlu0 %2485  ;;  %v2456_v5 = vmul.f32 %v2448_v10, %v5227_v41 }
 0x27b   :  { %v2444_v38 = vpop.permute.xlu1 %2443  ;;  %v2460_v33 = vadd.f32 %v2456_v5, %v2410_v19 }
 0x27c   :  { %v2449_v40 = vsel %vm2445_vm15, %v4703_v32, %v2444_v38 }
 0x27d   :  { %v2490_v39 = vpop.permute.xlu0 %2489 }
 0x27f   :  { %v2488_v12 = vpop.permute.xlu1 %2487 }
 0x280   :  { %v2496_v28 = vsel %vm2495_vm0, %v2486_v1, %v2488_v12  ;;  %v5228_v1 = vrot.slane %v4662_v20, %v3209_v56  ;;  %v2497_v24 = vsel %vm2495_vm0, %v2488_v12, %v2490_v39  ;;  %v5230_v20 = vrot.slane %v4678_v57, %v3221_v4 }
 0x281   :  { %v2494_v62 = vpop.permute.xlu0 %2493  ;;  %v2504_v61 = vmul.f32 %v2496_v28, %v2468_v27  ;;  %v5232_v27 = vrot.slane %v4709_v55, %v3207_v3  ;;  %v2505_v53 = vmul.f32 %v2497_v24, %v5233_v6 }
 0x282   :  { %v2407_v42 = vmul.f32 %v2399_v14, %v5228_v1  ;;  %v2455_v22 = vmul.f32 %v2447_v30, %v5230_v20  ;;  %v2565_v14 = vstv %s4890_s1  ;;  %s2802_s1 = smov [#allocation8]  }
 0x283   :  { %v2492_v54 = vpop.permute.xlu1 %2491  ;;  %v2508_v13 = vadd.f32 %v2504_v61, %v2458_v52  ;;  %s2598_s4 = sshll.u32 %s2802_s1, 4  ;;  %s2599_s4 = int_to_ptr.vmem [resolvable:$true] %s2598_s4 }
 0x284   :  { %v2498_v23 = vsel %vm2495_vm0, %v2490_v39, %v2492_v54  ;;  %v2499_v32 = vsel %vm2495_vm0, %v2492_v54, %v2494_v62  ;;  %v5231_v39 = vrot.slane %v4678_v57, %v3209_v56  ;;  %v2411_v59 = vadd.f32 %v2407_v42, %v2361_v46  ;;  %s2720_s5 = scalar_lea.vmem %s2599_s4, 64  ;;  %p2725_p3 = scmp.lt.s32.totalorder %s2599_s4, %s2599_s4 }
 0x285   :  { %v2538_v60 = vpop.permute.xlu0 %2537  ;;  %v2506_v18 = vmul.f32 %v2498_v23, %v5229_v43  ;;  %v2507_v57 = vmul.f32 %v2499_v32, %v5234_v25  ;;  %v2459_v37 = vadd.f32 %v2455_v22, %v2409_v31  ;;  %p2721_p2 = scmp.ne.s32.totalorder %s2599_s4, %s2720_s5  ;;  %p2726_p4 = scmp.lt.s32.totalorder %s2720_s5, %s2720_s5 }
 0x286   :  { %v2457_v12 = vmul.f32 %v2449_v40, %v5231_v39 }
 0x287   :  { %v2536_v2 = vpop.permute.xlu1 %2535  ;;  %v2510_v54 = vadd.f32 %v2506_v18, %v2460_v33  ;;  %v2509_v26 = vadd.f32 %v2505_v53, %v2459_v37  ;;  %p2727_p5 = por %p2726_p4, %p2725_p3 }
 0x288   :  { %v2546_v29 = vsel %vm2545_vm1, %v2536_v2, %v2538_v60  ;;  %v2461_v15 = vadd.f32 %v2457_v12, %v2411_v59 }
 0x289   :  { %v2542_v38 = vpop.permute.xlu0 %2541  ;;  %v2554_v8 = vmul.f32 %v2546_v29, %v5232_v27  ;;  %p2728_p6 = pnand %p2727_p5, %p2721_p2 }
 0x28a   :  { %v2511_v21 = vadd.f32 %v2507_v57, %v2461_v15 }
 0x28b   :  { %v2540_v63 = vpop.permute.xlu1 %2539  ;;  %v2558_v9 = vadd.f32 %v2554_v8, %v2508_v13 }
 0x28c   :  { %v2547_v48 = vsel %vm2545_vm1, %v2538_v60, %v2540_v63  ;;  %v2548_v62 = vsel %vm2545_vm1, %v2540_v63, %v2542_v38 }
 0x28d   :  { %v2556_v3 = vmul.f32 %v2548_v62, %v2526_v16  ;;  %v2555_v10 = vmul.f32 %v2547_v48, %v5235_v11 }
 0x28f   :  { %v2560_v50 = vadd.f32 %v2556_v3, %v2510_v54  ;;  %v2544_v36 = vpop.permute.xlu1 %2543  ;;  %v2559_v16 = vadd.f32 %v2555_v10, %v2509_v26 }
 0x290   :  { %v2549_v47 = vsel %vm2545_vm1, %v2542_v38, %v2544_v36 }
 0x291   :  { %v2562_v17 = vadd.f32 %v2560_v50, %v2558_v9  ;;  %v2557_v0 = vmul.f32 %v2549_v47, %v2530_v58 }
 0x293   :  { %v2566_v34 = vadd.f32 %v2565_v14, %v2562_v17  ;;  %v2561_v49 = vadd.f32 %v2557_v0, %v2511_v21 }
 0x295   :  { %v2608_v4 = vmul.f32 -1.442695, %v2566_v34  ;;  %v2563_v7 = vadd.f32 %v2561_v49, %v2559_v16 }
 0x297   :  { %2668 = vpow2.f32 %v2608_v4  ;;  %v2567_v28 = vadd.f32 %v2565_v14, %v2563_v7 }
 0x299   :  { %v2609_v23 = vmul.f32 -1.442695, %v2567_v28 }
 0x29b   :  { %2670 = vpow2.f32 %v2609_v23 }
 0x2a1   :  { %v2669_v60 = vpop.eup %2668 }
 0x2a2   :  { %v2574_v44 = vadd.f32 1.0, %v2669_v60 }
 0x2a4   :  { %2672 = vrcp.f32 %v2574_v44 }
 0x2a5   :  { %v2671_v51 = vpop.eup %2670 }
 0x2a6   :  { %v2575_v35 = vadd.f32 1.0, %v2671_v51 }
 0x2a8   :  { %2674 = vrcp.f32 %v2575_v35 }
 0x2ae   :  { %v2673_v30 = vpop.eup %2672 }
 0x2b2   :  { %v2675_v56 = vpop.eup %2674 }
 0x2b3   :  { %v2582_v55 = vcombine.low %v2673_v30, %v2675_v56 }
 0x2b5   :  { %2610 = vst.sshfl [vmem:[#allocation8] sm:$0x33 pattern:$0x76325410] %v2582_v55 }
 0x2b6   :  { %2731 = shalt.err (!%p2728_p6)
}
 0x2b7   :  { %s2732_s8 = scalar_lea.hbm %s4892_s3, 64 }
 0x2b8   :  { %p2733_p7 = scmp.ne.s32.totalorder %s4892_s3, %s2732_s8  ;;  %p2736_p8 = scmp.lt.u32.totalorder %s2732_s8, %s4892_s3 }
 0x2ba   :  { %p2738_p9 = pnand %p2736_p8, %p2733_p7 }
 0x2bc   :  { %2741 = shalt.err (!%p2738_p9)
}
 0x2bd   :  { %2601 = dma.vmem_to_hbm [thread:$0]  %s2599_s4, 64, %s4892_s3, [#allocation5]  }
 0x2be   :  { %2746 = dma.done.wait [#allocation5], 64  }
 0x2bf   :  { %2747 = vsyncadd [#allocation5], 4294967232 }
 0x2c0   :  { %2605 = vsyncpa [#allocation4], 1 }
 0x2c1   :  { %2606 = vsyncpa [#allocation7], 1 }
 0x2c2   :  { %2607 = vsyncpa [#allocation5], 1 }

</bundles_post_ra>
